<compile_context>
chip_gen: v7x
topology: tpu7x:2x2x1
jax: 0.10.0
libtpu: 0.0.40
codegen_flags: <defaults>
</compile_context>

<pallas_src>
import math
import functools

import jax
import jax.numpy as jnp
from jax import lax
from jax.experimental import pallas as pl
from jax.experimental.pallas import tpu as pltpu


def _round_up(x, m):
    return (x + m - 1) // m * m


def _resident_spec(shape):
    """BlockSpec for a grid-invariant (weight/bias) array: whole array, constant index.

    Single-buffered when the JAX version supports pipeline_mode -- constant blocks do
    not need double buffering, halving their VMEM footprint (headroom on v7x)."""
    index_map = lambda b, q: (0,) * len(shape)
    try:
        return pl.BlockSpec(shape, index_map, pipeline_mode=pl.Buffered(1))
    except TypeError:  # older JAX without pipeline_mode on BlockSpec
        return pl.BlockSpec(shape, index_map)


def _tpu_defaults():
    """(tile_q, vmem_limit_bytes) per chip generation."""
    kind = ""
    try:
        kind = jax.devices()[0].device_kind.lower()
    except Exception:
        pass
    if "v7" in kind or "7x" in kind:
        # 64 MiB physical VMEM per TC: smaller q tile, leave headroom for Mosaic scratch.
        return 256, 52 * 1024 * 1024
    if "v5" in kind or "v6" in kind:
        # 128 MiB physical VMEM: larger q tile halves per-step overhead, better M-fill.
        return 1024, 100 * 1024 * 1024
    return 512, 48 * 1024 * 1024  # unknown chip: conservative


def _cross_attention_kernel(x_ref, ctx_ref, wq_ref, wk_ref, wv_ref, wo_ref, bo_ref,
                            o_ref, k_scr, v_scr, o_scr, *,
                            num_heads, head_dim, sk_valid, mxu_dtype):
    """One (batch, q-tile) grid point: Q projection + multi-head attention + out proj.
    K/V projections run only at the first q-tile of each batch (cached in VMEM)."""
    f32 = jnp.float32
    cd = f32 if mxu_dtype is None else mxu_dtype   # MXU operand dtype
    recip_approx = mxu_dtype is not None           # exact divide on the f32 path

    # --- K/V projection: once per batch. The q-tile axis is "arbitrary" (sequential),
    # so program_id(1) == 0 marks the start of every batch on every core. ---
    @pl.when(pl.program_id(1) == 0)
    def _():
        ctx = ctx_ref[0]                           # (Skp, D), already MXU dtype
        if mxu_dtype is not None:
            ctx = ctx.astype(mxu_dtype)            # no-op (wrapper casts), kept for safety
        k_scr[...] = jnp.dot(ctx, wk_ref[...],
                             preferred_element_type=f32).astype(k_scr.dtype)
        v_scr[...] = jnp.dot(ctx, wv_ref[...],
                             preferred_element_type=f32).astype(v_scr.dtype)

    x = x_ref[0]                                   # (TQ, D)
    if mxu_dtype is not None:
        x = x.astype(mxu_dtype)
    # 1/sqrt(head_dim) is folded into Wq; f32 accumulation.
    q = jnp.dot(x, wq_ref[...], preferred_element_type=f32)     # (TQ, inner)
    qc = q.astype(cd)

    skp = k_scr.shape[0]

    # Additive mask for padded key columns, built once as a broadcast row.
    if sk_valid != skp:
        col = lax.broadcasted_iota(jnp.int32, (1, skp), 1)
        mask_bias = jnp.where(col < sk_valid, 0.0, -1e30).astype(f32)   # (1, Skp)
    else:
        mask_bias = None

    # Per-head attention; head outputs written head-major into o_scr so the output
    # projection below is a single K=inner matmul (no per-head fold / VALU add chain).
    for h in range(num_heads):
        lo = h * head_dim
        hi = lo + head_dim
        q_h = qc[:, lo:hi]                         # (TQ,  hd)
        k_h = k_scr[:, lo:hi]                      # (Skp, hd)  cached, MXU dtype
        v_h = v_scr[:, lo:hi]                      # (Skp, hd)

        # scores = q_h @ k_h^T without materializing the transpose.
        s = lax.dot_general(q_h, k_h, (((1,), (1,)), ((), ())),
                            preferred_element_type=f32)          # (TQ, Skp)
        if mask_bias is not None:
            s = s + mask_bias

        # Softmax in f32; normalization deferred to after the PV matmul.
        m = jnp.max(s, axis=-1, keepdims=True)
        p = jnp.exp(s - m)
        l = jnp.sum(p, axis=-1, keepdims=True)                   # (TQ, 1)

        o_h = jnp.dot(p.astype(cd), v_h, preferred_element_type=f32)   # (TQ, hd)
        o_h = o_h * pl.reciprocal(l, approx=recip_approx)
        o_scr[:, lo:hi] = o_h.astype(o_scr.dtype)

    # Single output projection (K = inner) + bias; Dropout(p=0) == identity.
    out = jnp.dot(o_scr[...], wo_ref[...], preferred_element_type=f32) + bo_ref[...]
    o_ref[0] = out.astype(o_ref.dtype)


def prepare_cross_attention_params(params, *, num_head_channels, mxu_dtype=None):
    """One-time conversion of PyTorch-layout Linear weights ([out, in]) into the
    layout the kernel consumes ([in, out]) with the attention scale folded into Wq.
    Call at parameter-load time so no per-call transposes are emitted."""
    scale = 1.0 / math.sqrt(num_head_channels)
    w_dtype = params["to_q"].dtype if mxu_dtype is None else mxu_dtype
    return {
        "wq": (params["to_q"].T * scale).astype(w_dtype),   # (D, inner), pre-scaled
        "wk": params["to_k"].T.astype(w_dtype),              # (D, inner)
        "wv": params["to_v"].T.astype(w_dtype),              # (D, inner)
        "wo": params["to_out_w"].T.astype(w_dtype),          # (inner, D)
        "bo": params["to_out_b"].reshape(1, -1).astype(jnp.float32),
    }


def cross_attention(x, context, prepared, *, num_heads, num_head_channels,
                    tile_q=None, mxu_dtype=None, vmem_limit_bytes=None):
    """x: (B, Sq, D), context: (B, Sk, D). Returns (B, Sq, D) in x's original dtype."""
    B, Sq, D = x.shape
    Bc, Sk, Dc = context.shape
    assert Bc == B and Dc == D, "to_k/to_v project from query_dim"
    inner = num_heads * num_head_channels
    out_dtype = x.dtype

    default_tq, default_vmem = _tpu_defaults()
    if tile_q is None:
        tile_q = default_tq
    if vmem_limit_bytes is None:
        vmem_limit_bytes = default_vmem

    # bf16 path: cast activations at the wrapper so input DMA moves half the bytes.
    if mxu_dtype is not None:
        x = x.astype(mxu_dtype)
        context = context.astype(mxu_dtype)

    # --- query tiling (sublane-aligned for the activation dtype) + lane-dense keys ---
    sublane = 16 if x.dtype == jnp.bfloat16 else 8
    tq = min(_round_up(tile_q, sublane), _round_up(Sq, sublane))
    sq_pad = _round_up(Sq, tq)
    sk_pad = _round_up(Sk, 128)

    if sq_pad != Sq:
        x = jnp.pad(x, ((0, 0), (0, sq_pad - Sq), (0, 0)))
    if sk_pad != Sk:
        context = jnp.pad(context, ((0, 0), (0, sk_pad - Sk), (0, 0)))

    n_q = sq_pad // tq
    cd = jnp.float32 if mxu_dtype is None else mxu_dtype

    kernel = functools.partial(
        _cross_attention_kernel,
        num_heads=num_heads, head_dim=num_head_channels,
        sk_valid=Sk, mxu_dtype=mxu_dtype)

    out = pl.pallas_call(
        kernel,
        out_shape=jax.ShapeDtypeStruct((B, sq_pad, D), out_dtype),
        grid_spec=pltpu.PrefetchScalarGridSpec(
            num_scalar_prefetch=0,
            grid=(B, n_q),
            in_specs=[
                pl.BlockSpec((1, tq, D), lambda b, q: (b, q, 0)),      # x q-tile
                pl.BlockSpec((1, sk_pad, D), lambda b, q: (b, 0, 0)),  # context (per batch)
                _resident_spec((D, inner)),                            # Wq (pre-scaled)
                _resident_spec((D, inner)),                            # Wk
                _resident_spec((D, inner)),                            # Wv
                _resident_spec((inner, D)),                            # Wo
                _resident_spec((1, D)),                                # bias
            ],
            out_specs=pl.BlockSpec((1, tq, D), lambda b, q: (b, q, 0)),
            scratch_shapes=[
                pltpu.VMEM((sk_pad, inner), cd),   # K cache (per batch)
                pltpu.VMEM((sk_pad, inner), cd),   # V cache (per batch)
                pltpu.VMEM((tq, inner), cd),       # concatenated head outputs
            ],
        ),
        compiler_params=pltpu.CompilerParams(
            # batch axis parallel (megacore); q-tile axis arbitrary (sequential) so the
            # per-batch K/V cache init at program_id(1)==0 is valid.
            dimension_semantics=("parallel", "arbitrary"),
            vmem_limit_bytes=vmem_limit_bytes),
    )(x, context, prepared["wq"], prepared["wk"], prepared["wv"],
      prepared["wo"], prepared["bo"])

    if sq_pad != Sq:
        out = out[:, :Sq, :]
    return out


def _reference(x, context, params, *, num_heads, num_head_channels):
    """Pure-JAX reference mirroring the PyTorch forward."""
    B, Sq, D = x.shape
    inner = num_heads * num_head_channels
    scale = 1.0 / math.sqrt(num_head_channels)
    q = x @ params["to_q"].T
    k = context @ params["to_k"].T
    v = context @ params["to_v"].T

    def to_heads(t):
        b, s, _ = t.shape
        return t.reshape(b, s, num_heads, num_head_channels).transpose(0, 2, 1, 3) \
                .reshape(b * num_heads, s, num_head_channels)

    q, k, v = to_heads(q), to_heads(k), to_heads(v)
    scores = jnp.einsum("bqd,bkd->bqk", q, k) * scale
    probs = jax.nn.softmax(scores, axis=-1)
    o = jnp.einsum("bqk,bkd->bqd", probs, v)
    o = o.reshape(B, num_heads, Sq, num_head_channels).transpose(0, 2, 1, 3) \
         .reshape(B, Sq, inner)
    return o @ params["to_out_w"].T + params["to_out_b"]


if __name__ == "__main__":
    B, Sq, Sk = 2, 16, 8
    query_dim = 32
    num_heads = 4
    num_head_channels = 8
    inner_dim = num_heads * num_head_channels  # 32

    key = jax.random.PRNGKey(0)
    kx, kc, k1, k2, k3, k4, k5 = jax.random.split(key, 7)

    x = jax.random.normal(kx, (B, Sq, query_dim), dtype=jnp.float32)
    context = jax.random.normal(kc, (B, Sk, query_dim), dtype=jnp.float32)

    # Deterministic synthetic parameters (PyTorch Linear convention: weight is [out, in]).
    params = {
        "to_q": 0.05 * jax.random.normal(k1, (inner_dim, query_dim), dtype=jnp.float32),
        "to_k": 0.05 * jax.random.normal(k2, (inner_dim, query_dim), dtype=jnp.float32),
        "to_v": 0.05 * jax.random.normal(k3, (inner_dim, query_dim), dtype=jnp.float32),
        "to_out_w": 0.05 * jax.random.normal(k4, (query_dim, inner_dim), dtype=jnp.float32),
        "to_out_b": 0.05 * jax.random.normal(k5, (query_dim,), dtype=jnp.float32),
    }

    ref = _reference(x, context, params,
                     num_heads=num_heads, num_head_channels=num_head_channels)

    # f32 MXU-operand path: tight check vs. pure-JAX reference.
    prepared = prepare_cross_attention_params(params, num_head_channels=num_head_channels)
    out = cross_attention(x, context, prepared,
                          num_heads=num_heads, num_head_channels=num_head_channels)
    out = jax.block_until_ready(out)
    assert out.shape == (B, Sq, query_dim)
    assert jnp.allclose(out, ref, atol=2e-3, rtol=2e-3), "f32 kernel mismatch vs reference"

    # bf16 MXU-operand path (recommended on v6e/v7x); f32 accumulation + f32 softmax.
    prepared_bf16 = prepare_cross_attention_params(
        params, num_head_channels=num_head_channels, mxu_dtype=jnp.bfloat16)
    out_bf16 = cross_attention(x, context, prepared_bf16,
                               num_heads=num_heads, num_head_channels=num_head_channels,
                               mxu_dtype=jnp.bfloat16)
    out_bf16 = jax.block_until_ready(out_bf16)
    assert out_bf16.shape == (B, Sq, query_dim)
    assert jnp.allclose(out_bf16, ref, atol=5e-2, rtol=5e-2), "bf16 kernel mismatch vs reference"

    print("KERNEL_OK")
</pallas_src>

<mosaic_0001>
module attributes {stable_mosaic.version = 11 : i64} {
  func.func @_cross_attention_kernel(%arg0: i32, %arg1: i32, %arg2: memref<1x16x32xf32, #tpu.memory_space<vmem>>, %arg3: memref<1x128x32xf32, #tpu.memory_space<vmem>>, %arg4: memref<32x32xf32, #tpu.memory_space<vmem>>, %arg5: memref<32x32xf32, #tpu.memory_space<vmem>>, %arg6: memref<32x32xf32, #tpu.memory_space<vmem>>, %arg7: memref<32x32xf32, #tpu.memory_space<vmem>>, %arg8: memref<1x32xf32, #tpu.memory_space<vmem>>, %arg9: memref<1x16x32xf32, #tpu.memory_space<vmem>>, %arg10: memref<128x32xf32, #tpu.memory_space<vmem>>, %arg11: memref<128x32xf32, #tpu.memory_space<vmem>>, %arg12: memref<16x32xf32, #tpu.memory_space<vmem>>) attributes {dimension_semantics = [#tpu.dimension_semantics<parallel>, #tpu.dimension_semantics<arbitrary>], iteration_bounds = array<i64: 2, 1>, scalar_prefetch = 0 : i64, scratch_operands = 3 : i64, tpu.core_type = #tpu.core_type<tc>, window_params = [{transform_indices = @transform_0, window_bounds = array<i64: 1, 16, 32>}, {transform_indices = @transform_1, window_bounds = array<i64: 1, 128, 32>}, {pipeline_mode = #tpu.pipeline_mode<synchronous>, transform_indices = @transform_2, window_bounds = array<i64: 32, 32>}, {pipeline_mode = #tpu.pipeline_mode<synchronous>, transform_indices = @transform_3, window_bounds = array<i64: 32, 32>}, {pipeline_mode = #tpu.pipeline_mode<synchronous>, transform_indices = @transform_4, window_bounds = array<i64: 32, 32>}, {pipeline_mode = #tpu.pipeline_mode<synchronous>, transform_indices = @transform_5, window_bounds = array<i64: 32, 32>}, {pipeline_mode = #tpu.pipeline_mode<synchronous>, transform_indices = @transform_6, window_bounds = array<i64: 1, 32>}, {transform_indices = @transform_7, window_bounds = array<i64: 1, 16, 32>}]} {
    %c0_i32 = arith.constant 0 : i32
    %0 = arith.cmpi eq, %arg1, %c0_i32 : i32
    %1 = arith.extui %0 : i1 to i32
    %c0_i32_0 = arith.constant 0 : i32
    %2 = arith.cmpi ne, %1, %c0_i32_0 : i32
    scf.if %2 {
      %c0_54 = arith.constant 0 : index
      %c0_55 = arith.constant 0 : index
      %c0_56 = arith.constant 0 : index
      %94 = vector.load %arg3[%c0_54, %c0_55, %c0_56] : memref<1x128x32xf32, #tpu.memory_space<vmem>>, vector<1x128x32xf32>
      %95 = vector.shape_cast %94 : vector<1x128x32xf32> to vector<128x32xf32>
      %c0_57 = arith.constant 0 : index
      %c0_58 = arith.constant 0 : index
      %96 = vector.load %arg5[%c0_57, %c0_58] : memref<32x32xf32, #tpu.memory_space<vmem>>, vector<32x32xf32>
      %cst_59 = arith.constant dense<0.000000e+00> : vector<128x32xf32>
      %97 = tpu.matmul %95, %96, %cst_59 {dimension_numbers = #tpu.dot_dimension_numbers<[1], [0], [0], [1], [0, 0, 1, 1], [], []>} : vector<128x32xf32>, vector<32x32xf32>, vector<128x32xf32> -> vector<128x32xf32>
      %c0_60 = arith.constant 0 : index
      %c0_61 = arith.constant 0 : index
      %98 = vector.load %arg10[%c0_60, %c0_61] : memref<128x32xf32, #tpu.memory_space<vmem>>, vector<128x32xf32>
      tpu.vector_store %arg10[%c0_60, %c0_61], %97 {strides = array<i32>} : memref<128x32xf32, #tpu.memory_space<vmem>>, vector<128x32xf32>,
      %c0_62 = arith.constant 0 : index
      %c0_63 = arith.constant 0 : index
      %99 = vector.load %arg6[%c0_62, %c0_63] : memref<32x32xf32, #tpu.memory_space<vmem>>, vector<32x32xf32>
      %cst_64 = arith.constant dense<0.000000e+00> : vector<128x32xf32>
      %100 = tpu.matmul %95, %99, %cst_64 {dimension_numbers = #tpu.dot_dimension_numbers<[1], [0], [0], [1], [0, 0, 1, 1], [], []>} : vector<128x32xf32>, vector<32x32xf32>, vector<128x32xf32> -> vector<128x32xf32>
      %c0_65 = arith.constant 0 : index
      %c0_66 = arith.constant 0 : index
      %101 = vector.load %arg11[%c0_65, %c0_66] : memref<128x32xf32, #tpu.memory_space<vmem>>, vector<128x32xf32>
      tpu.vector_store %arg11[%c0_65, %c0_66], %100 {strides = array<i32>} : memref<128x32xf32, #tpu.memory_space<vmem>>, vector<128x32xf32>,
    } else {
    }
    %c0 = arith.constant 0 : index
    %c0_1 = arith.constant 0 : index
    %c0_2 = arith.constant 0 : index
    %3 = vector.load %arg2[%c0, %c0_1, %c0_2] : memref<1x16x32xf32, #tpu.memory_space<vmem>>, vector<1x16x32xf32>
    %4 = vector.shape_cast %3 : vector<1x16x32xf32> to vector<16x32xf32>
    %c0_3 = arith.constant 0 : index
    %c0_4 = arith.constant 0 : index
    %5 = vector.load %arg4[%c0_3, %c0_4] : memref<32x32xf32, #tpu.memory_space<vmem>>, vector<32x32xf32>
    %cst = arith.constant dense<0.000000e+00> : vector<16x32xf32>
    %6 = tpu.matmul %4, %5, %cst {dimension_numbers = #tpu.dot_dimension_numbers<[1], [0], [0], [1], [0, 0, 1, 1], [], []>} : vector<16x32xf32>, vector<32x32xf32>, vector<16x32xf32> -> vector<16x32xf32>
    %7 = tpu.iota {dimensions = array<i32: 1>} : vector<1x128xi32>
    %c8_i32 = arith.constant 8 : i32
    %8 = vector.broadcast %c8_i32 : i32 to vector<1x128xi32>
    %9 = arith.cmpi slt, %7, %8 : vector<1x128xi32>
    %cst_5 = arith.constant 0.000000e+00 : f32
    %cst_6 = arith.constant -1.000000e+30 : f32
    %10 = vector.broadcast %cst_5 : f32 to vector<1x128xf32>
    %11 = vector.broadcast %cst_6 : f32 to vector<1x128xf32>
    %12 = arith.select %9, %10, %11 : vector<1x128xi1>, vector<1x128xf32>
    %13 = vector.extract_strided_slice %6 {offsets = [0, 0], sizes = [16, 8], strides = [1, 1]} : vector<16x32xf32> to vector<16x8xf32>
    %c0_7 = arith.constant 0 : index
    %c0_8 = arith.constant 0 : index
    %14 = vector.load %arg10[%c0_7, %c0_8] : memref<128x32xf32, #tpu.memory_space<vmem>>, vector<128x8xf32>
    %c0_9 = arith.constant 0 : index
    %c0_10 = arith.constant 0 : index
    %15 = vector.load %arg11[%c0_9, %c0_10] : memref<128x32xf32, #tpu.memory_space<vmem>>, vector<128x8xf32>
    %cst_11 = arith.constant dense<0.000000e+00> : vector<16x128xf32>
    %16 = tpu.matmul %13, %14, %cst_11 {dimension_numbers = #tpu.dot_dimension_numbers<[1], [1], [0], [0], [0, 0, 1, 0], [], []>} : vector<16x8xf32>, vector<128x8xf32>, vector<16x128xf32> -> vector<16x128xf32>
    %17 = vector.broadcast %12 : vector<1x128xf32> to vector<16x128xf32>
    %18 = arith.addf %16, %17 : vector<16x128xf32>
    %cst_12 = arith.constant dense<0xFF800000> : vector<16xf32>
    %19 = vector.multi_reduction <maximumf>, %18, %cst_12 [1] : vector<16x128xf32> to vector<16xf32>
    %20 = vector.shape_cast %19 : vector<16xf32> to vector<16x1xf32>
    %21 = vector.broadcast %20 : vector<16x1xf32> to vector<16x128xf32>
    %22 = arith.subf %18, %21 : vector<16x128xf32>
    %23 = math.exp %22 : vector<16x128xf32>
    %cst_13 = arith.constant dense<0.000000e+00> : vector<16xf32>
    %24 = vector.multi_reduction <add>, %23, %cst_13 [1] : vector<16x128xf32> to vector<16xf32>
    %25 = vector.shape_cast %24 : vector<16xf32> to vector<16x1xf32>
    %cst_14 = arith.constant dense<0.000000e+00> : vector<16x8xf32>
    %26 = tpu.matmul %23, %15, %cst_14 {dimension_numbers = #tpu.dot_dimension_numbers<[1], [0], [0], [1], [0, 0, 1, 1], [], []>} : vector<16x128xf32>, vector<128x8xf32>, vector<16x8xf32> -> vector<16x8xf32>
    %27 = tpu.reciprocal %25 : vector<16x1xf32> -> vector<16x1xf32>
    %28 = vector.broadcast %27 : vector<16x1xf32> to vector<16x8xf32>
    %29 = arith.mulf %26, %28 : vector<16x8xf32>
    %c0_15 = arith.constant 0 : index
    %c0_16 = arith.constant 0 : index
    %30 = vector.load %arg12[%c0_15, %c0_16] : memref<16x32xf32, #tpu.memory_space<vmem>>, vector<16x8xf32>
    tpu.vector_store %arg12[%c0_15, %c0_16], %29 {strides = array<i32>} : memref<16x32xf32, #tpu.memory_space<vmem>>, vector<16x8xf32>,
    %31 = vector.extract_strided_slice %6 {offsets = [0, 8], sizes = [16, 8], strides = [1, 1]} : vector<16x32xf32> to vector<16x8xf32>
    %c0_17 = arith.constant 0 : index
    %c8 = arith.constant 8 : index
    %32 = vector.load %arg10[%c0_17, %c8] : memref<128x32xf32, #tpu.memory_space<vmem>>, vector<128x8xf32>
    %c0_18 = arith.constant 0 : index
    %c8_19 = arith.constant 8 : index
    %33 = vector.load %arg11[%c0_18, %c8_19] : memref<128x32xf32, #tpu.memory_space<vmem>>, vector<128x8xf32>
    %cst_20 = arith.constant dense<0.000000e+00> : vector<16x128xf32>
    %34 = tpu.matmul %31, %32, %cst_20 {dimension_numbers = #tpu.dot_dimension_numbers<[1], [1], [0], [0], [0, 0, 1, 0], [], []>} : vector<16x8xf32>, vector<128x8xf32>, vector<16x128xf32> -> vector<16x128xf32>
    %35 = vector.broadcast %12 : vector<1x128xf32> to vector<16x128xf32>
    %36 = arith.addf %34, %35 : vector<16x128xf32>
    %cst_21 = arith.constant dense<0xFF800000> : vector<16xf32>
    %37 = vector.multi_reduction <maximumf>, %36, %cst_21 [1] : vector<16x128xf32> to vector<16xf32>
    %38 = vector.shape_cast %37 : vector<16xf32> to vector<16x1xf32>
    %39 = vector.broadcast %38 : vector<16x1xf32> to vector<16x128xf32>
    %40 = arith.subf %36, %39 : vector<16x128xf32>
    %41 = math.exp %40 : vector<16x128xf32>
    %cst_22 = arith.constant dense<0.000000e+00> : vector<16xf32>
    %42 = vector.multi_reduction <add>, %41, %cst_22 [1] : vector<16x128xf32> to vector<16xf32>
    %43 = vector.shape_cast %42 : vector<16xf32> to vector<16x1xf32>
    %cst_23 = arith.constant dense<0.000000e+00> : vector<16x8xf32>
    %44 = tpu.matmul %41, %33, %cst_23 {dimension_numbers = #tpu.dot_dimension_numbers<[1], [0], [0], [1], [0, 0, 1, 1], [], []>} : vector<16x128xf32>, vector<128x8xf32>, vector<16x8xf32> -> vector<16x8xf32>
    %45 = tpu.reciprocal %43 : vector<16x1xf32> -> vector<16x1xf32>
    %46 = vector.broadcast %45 : vector<16x1xf32> to vector<16x8xf32>
    %47 = arith.mulf %44, %46 : vector<16x8xf32>
    %c0_24 = arith.constant 0 : index
    %c8_25 = arith.constant 8 : index
    %48 = vector.load %arg12[%c0_24, %c8_25] : memref<16x32xf32, #tpu.memory_space<vmem>>, vector<16x8xf32>
    tpu.vector_store %arg12[%c0_24, %c8_25], %47 {strides = array<i32>} : memref<16x32xf32, #tpu.memory_space<vmem>>, vector<16x8xf32>,
    %49 = vector.extract_strided_slice %6 {offsets = [0, 16], sizes = [16, 8], strides = [1, 1]} : vector<16x32xf32> to vector<16x8xf32>
    %c0_26 = arith.constant 0 : index
    %c16 = arith.constant 16 : index
    %50 = vector.load %arg10[%c0_26, %c16] : memref<128x32xf32, #tpu.memory_space<vmem>>, vector<128x8xf32>
    %c0_27 = arith.constant 0 : index
    %c16_28 = arith.constant 16 : index
    %51 = vector.load %arg11[%c0_27, %c16_28] : memref<128x32xf32, #tpu.memory_space<vmem>>, vector<128x8xf32>
    %cst_29 = arith.constant dense<0.000000e+00> : vector<16x128xf32>
    %52 = tpu.matmul %49, %50, %cst_29 {dimension_numbers = #tpu.dot_dimension_numbers<[1], [1], [0], [0], [0, 0, 1, 0], [], []>} : vector<16x8xf32>, vector<128x8xf32>, vector<16x128xf32> -> vector<16x128xf32>
    %53 = vector.broadcast %12 : vector<1x128xf32> to vector<16x128xf32>
    %54 = arith.addf %52, %53 : vector<16x128xf32>
    %cst_30 = arith.constant dense<0xFF800000> : vector<16xf32>
    %55 = vector.multi_reduction <maximumf>, %54, %cst_30 [1] : vector<16x128xf32> to vector<16xf32>
    %56 = vector.shape_cast %55 : vector<16xf32> to vector<16x1xf32>
    %57 = vector.broadcast %56 : vector<16x1xf32> to vector<16x128xf32>
    %58 = arith.subf %54, %57 : vector<16x128xf32>
    %59 = math.exp %58 : vector<16x128xf32>
    %cst_31 = arith.constant dense<0.000000e+00> : vector<16xf32>
    %60 = vector.multi_reduction <add>, %59, %cst_31 [1] : vector<16x128xf32> to vector<16xf32>
    %61 = vector.shape_cast %60 : vector<16xf32> to vector<16x1xf32>
    %cst_32 = arith.constant dense<0.000000e+00> : vector<16x8xf32>
    %62 = tpu.matmul %59, %51, %cst_32 {dimension_numbers = #tpu.dot_dimension_numbers<[1], [0], [0], [1], [0, 0, 1, 1], [], []>} : vector<16x128xf32>, vector<128x8xf32>, vector<16x8xf32> -> vector<16x8xf32>
    %63 = tpu.reciprocal %61 : vector<16x1xf32> -> vector<16x1xf32>
    %64 = vector.broadcast %63 : vector<16x1xf32> to vector<16x8xf32>
    %65 = arith.mulf %62, %64 : vector<16x8xf32>
    %c0_33 = arith.constant 0 : index
    %c16_34 = arith.constant 16 : index
    %66 = vector.load %arg12[%c0_33, %c16_34] : memref<16x32xf32, #tpu.memory_space<vmem>>, vector<16x8xf32>
    tpu.vector_store %arg12[%c0_33, %c16_34], %65 {strides = array<i32>} : memref<16x32xf32, #tpu.memory_space<vmem>>, vector<16x8xf32>,
    %67 = vector.extract_strided_slice %6 {offsets = [0, 24], sizes = [16, 8], strides = [1, 1]} : vector<16x32xf32> to vector<16x8xf32>
    %c0_35 = arith.constant 0 : index
    %c24 = arith.constant 24 : index
    %68 = vector.load %arg10[%c0_35, %c24] : memref<128x32xf32, #tpu.memory_space<vmem>>, vector<128x8xf32>
    %c0_36 = arith.constant 0 : index
    %c24_37 = arith.constant 24 : index
    %69 = vector.load %arg11[%c0_36, %c24_37] : memref<128x32xf32, #tpu.memory_space<vmem>>, vector<128x8xf32>
    %cst_38 = arith.constant dense<0.000000e+00> : vector<16x128xf32>
    %70 = tpu.matmul %67, %68, %cst_38 {dimension_numbers = #tpu.dot_dimension_numbers<[1], [1], [0], [0], [0, 0, 1, 0], [], []>} : vector<16x8xf32>, vector<128x8xf32>, vector<16x128xf32> -> vector<16x128xf32>
    %71 = vector.broadcast %12 : vector<1x128xf32> to vector<16x128xf32>
    %72 = arith.addf %70, %71 : vector<16x128xf32>
    %cst_39 = arith.constant dense<0xFF800000> : vector<16xf32>
    %73 = vector.multi_reduction <maximumf>, %72, %cst_39 [1] : vector<16x128xf32> to vector<16xf32>
    %74 = vector.shape_cast %73 : vector<16xf32> to vector<16x1xf32>
    %75 = vector.broadcast %74 : vector<16x1xf32> to vector<16x128xf32>
    %76 = arith.subf %72, %75 : vector<16x128xf32>
    %77 = math.exp %76 : vector<16x128xf32>
    %cst_40 = arith.constant dense<0.000000e+00> : vector<16xf32>
    %78 = vector.multi_reduction <add>, %77, %cst_40 [1] : vector<16x128xf32> to vector<16xf32>
    %79 = vector.shape_cast %78 : vector<16xf32> to vector<16x1xf32>
    %cst_41 = arith.constant dense<0.000000e+00> : vector<16x8xf32>
    %80 = tpu.matmul %77, %69, %cst_41 {dimension_numbers = #tpu.dot_dimension_numbers<[1], [0], [0], [1], [0, 0, 1, 1], [], []>} : vector<16x128xf32>, vector<128x8xf32>, vector<16x8xf32> -> vector<16x8xf32>
    %81 = tpu.reciprocal %79 : vector<16x1xf32> -> vector<16x1xf32>
    %82 = vector.broadcast %81 : vector<16x1xf32> to vector<16x8xf32>
    %83 = arith.mulf %80, %82 : vector<16x8xf32>
    %c0_42 = arith.constant 0 : index
    %c24_43 = arith.constant 24 : index
    %84 = vector.load %arg12[%c0_42, %c24_43] : memref<16x32xf32, #tpu.memory_space<vmem>>, vector<16x8xf32>
    tpu.vector_store %arg12[%c0_42, %c24_43], %83 {strides = array<i32>} : memref<16x32xf32, #tpu.memory_space<vmem>>, vector<16x8xf32>,
    %c0_44 = arith.constant 0 : index
    %c0_45 = arith.constant 0 : index
    %85 = vector.load %arg12[%c0_44, %c0_45] : memref<16x32xf32, #tpu.memory_space<vmem>>, vector<16x32xf32>
    %c0_46 = arith.constant 0 : index
    %c0_47 = arith.constant 0 : index
    %86 = vector.load %arg7[%c0_46, %c0_47] : memref<32x32xf32, #tpu.memory_space<vmem>>, vector<32x32xf32>
    %cst_48 = arith.constant dense<0.000000e+00> : vector<16x32xf32>
    %87 = tpu.matmul %85, %86, %cst_48 {dimension_numbers = #tpu.dot_dimension_numbers<[1], [0], [0], [1], [0, 0, 1, 1], [], []>} : vector<16x32xf32>, vector<32x32xf32>, vector<16x32xf32> -> vector<16x32xf32>
    %c0_49 = arith.constant 0 : index
    %c0_50 = arith.constant 0 : index
    %88 = vector.load %arg8[%c0_49, %c0_50] : memref<1x32xf32, #tpu.memory_space<vmem>>, vector<1x32xf32>
    %89 = vector.broadcast %88 : vector<1x32xf32> to vector<16x32xf32>
    %90 = arith.addf %87, %89 : vector<16x32xf32>
    %c0_51 = arith.constant 0 : index
    %c0_52 = arith.constant 0 : index
    %c0_53 = arith.constant 0 : index
    %91 = vector.load %arg9[%c0_51, %c0_52, %c0_53] : memref<1x16x32xf32, #tpu.memory_space<vmem>>, vector<1x16x32xf32>
    %92 = vector.shape_cast %91 : vector<1x16x32xf32> to vector<16x32xf32>
    %93 = vector.shape_cast %90 : vector<16x32xf32> to vector<1x16x32xf32>
    tpu.vector_store %arg9[%c0_51, %c0_52, %c0_53], %93 {strides = array<i32>} : memref<1x16x32xf32, #tpu.memory_space<vmem>>, vector<1x16x32xf32>,
    return
  }
  func.func @transform_0(%arg0: i32, %arg1: i32) -> (i32, i32, i32) {
    %c0_i32 = arith.constant 0 : i32
    %c0_i32_0 = arith.constant 0 : i32
    return %arg0, %arg1, %c0_i32 : i32, i32, i32
  }
  func.func @transform_1(%arg0: i32, %arg1: i32) -> (i32, i32, i32) {
    %c0_i32 = arith.constant 0 : i32
    %c0_i32_0 = arith.constant 0 : i32
    %c0_i32_1 = arith.constant 0 : i32
    return %arg0, %c0_i32, %c0_i32_0 : i32, i32, i32
  }
  func.func @transform_2(%arg0: i32, %arg1: i32) -> (i32, i32) {
    %c0_i32 = arith.constant 0 : i32
    %c0_i32_0 = arith.constant 0 : i32
    %c0_i32_1 = arith.constant 0 : i32
    return %c0_i32, %c0_i32_0 : i32, i32
  }
  func.func @transform_3(%arg0: i32, %arg1: i32) -> (i32, i32) {
    %c0_i32 = arith.constant 0 : i32
    %c0_i32_0 = arith.constant 0 : i32
    %c0_i32_1 = arith.constant 0 : i32
    return %c0_i32, %c0_i32_0 : i32, i32
  }
  func.func @transform_4(%arg0: i32, %arg1: i32) -> (i32, i32) {
    %c0_i32 = arith.constant 0 : i32
    %c0_i32_0 = arith.constant 0 : i32
    %c0_i32_1 = arith.constant 0 : i32
    return %c0_i32, %c0_i32_0 : i32, i32
  }
  func.func @transform_5(%arg0: i32, %arg1: i32) -> (i32, i32) {
    %c0_i32 = arith.constant 0 : i32
    %c0_i32_0 = arith.constant 0 : i32
    %c0_i32_1 = arith.constant 0 : i32
    return %c0_i32, %c0_i32_0 : i32, i32
  }
  func.func @transform_6(%arg0: i32, %arg1: i32) -> (i32, i32) {
    %c0_i32 = arith.constant 0 : i32
    %c0_i32_0 = arith.constant 0 : i32
    %c0_i32_1 = arith.constant 0 : i32
    return %c0_i32, %c0_i32_0 : i32, i32
  }
  func.func @transform_7(%arg0: i32, %arg1: i32) -> (i32, i32, i32) {
    %c0_i32 = arith.constant 0 : i32
    %c0_i32_0 = arith.constant 0 : i32
    return %arg0, %arg1, %c0_i32 : i32, i32, i32
  }
}

</mosaic_0001>

<bundles_post_ra>
// kernel: tpu_custom_call.1
= control target key start
LH: loop header
LB: loop body
LE: loop exit
PB: predicated region body
PF: predicated region fallthrough
CT: control target
= control target key end

     0   :  { %12 = vsyncpa [#allocation6], 0  ;;  %s4576_s0 = inlined_call_operand.vmem [shape: f32[2,16,32], index: 0, kind: input, shape index: {}]   ;;  %s4577_s1 = inlined_call_operand.vmem [shape: f32[2,128,32], index: 1, kind: input, shape index: {}]   ;;  %s4578_s2 = inlined_call_operand.vmem [shape: f32[32,32], index: 2, kind: input, shape index: {}]   ;;  %s4579_s3 = inlined_call_operand.vmem [shape: f32[32,32], index: 3, kind: input, shape index: {}]   ;;  %s4580_s4 = inlined_call_operand.vmem [shape: f32[32,32], index: 4, kind: input, shape index: {}]   ;;  %s4581_s5 = inlined_call_operand.vmem [shape: f32[32,32], index: 5, kind: input, shape index: {}]   ;;  %s4582_s6 = inlined_call_operand.vmem [shape: f32[1,32], index: 6, kind: input, shape index: {}]   ;;  %s4583_s7 = inlined_call_operand.hbm [shape: f32[2,16,32], index: 7, kind: output, shape index: {}]  }
   0x1   :  { %14 = vsyncpa [#allocation6 + $0x1], 0  ;;  %s3877_s24 = smov 0   ;;  %s3879_s25 = smov 0  }
   0x2   :  { %s3881_s26 = smov 0   ;;  %s3883_s27 = smov 0  }
   0x3   :  { %s3885_s28 = smov 0   ;;  %s3887_s29 = smov 0  }
   0x4 LB: > { %s2368_s30 = sadd.s32 4294967295, %s3826_s29   ;;  %s2369_s8 = sadd.s32 4294967294, %s3826_s29   ;;  %s3826_s29 = sphi %s3887_s29, %s20_s29   ;;  %s3822_s28 = sphi %s3885_s28, %s4592_s28   ;;  %s3818_s27 = sphi %s3883_s27, %s4591_s27   ;;  %s3814_s26 = sphi %s3881_s26, %s4590_s26   ;;  %s3810_s25 = sphi %s3879_s25, %s4589_s25   ;;  %s3806_s24 = sphi %s3877_s24, %s4588_s24  }
   0x5   : > { %s32_s9 = sadd.s32 1, %s3822_s28  ;;  %s200_s10 = sadd.s32 1, %s3814_s26 }
   0x6   : > { %p34_p0 = scmp.ge.s32.totalorder %s32_s9, 2  ;;  %p210_p1 = scmp.ne.s32.totalorder %s3814_s26, %s3810_s25 }
   0x7   : > { %p211_p2 = scmp.eq.s32.totalorder %s2368_s30, 1  ;;  %p216_p3 = scmp.ne.s32.totalorder %s3810_s25, %s3806_s24 }
   0x8   : > { %s4594_s9 = smov (%p34_p0, %s32_s9), 0  ;;  %p217_p5 = scmp.eq.s32.totalorder %s2369_s8, 1 }
   0x9   : > { %p3917_p4 = por %p211_p2, %p210_p1  ;;  %s195_s12 = ssub.s32 %s3822_s28, %s4594_s9 }
   0xa   : > { %p2372_p6 = scmp.ge.s32.totalorder %s3826_s29, 1  ;;  %p198_p7 = scmp.eq.s32.totalorder %s195_s12, 0 }
   0xb   : > { %p3924_p8 = por %p217_p5, %p216_p3  ;;  %p271_p9 = scmp.lt.s32.totalorder %s3826_s29, 3 }
   0xc   : > { %s3930_s14 = scalar_select %p198_p7, %s3814_s26, %s200_s10  }
   0xd   : > { %p272_p10 = pnand %p2372_p6, %p271_p9 }
   0xe   : > { %v348_v0 = vld [vmem:[%s4579_s3] sm:$0xff] (!%p272_p10)  ;;  %v349_v1 = vld [vmem:[%s4579_s3 + $0x8] sm:$0xff] (!%p272_p10)  ;;  %v350_v2 = vld [vmem:[%s4579_s3 + $0x10] sm:$0xff] (!%p272_p10)  ;;  %p313_p11 = scmp.lt.s32.totalorder (!%p272_p10), %s3818_s27, 1  ;;  %vm352_vm0 = vcmask (!%p272_p10), 261120   ;;  %vm851_vm1 = vcmask (!%p272_p10), 64512  }
   0xf   : > { %275 = sbr.rel (%p272_p10) target bundleno = 2573 (0xa0d), region = 48  ;;  %v3057_v3 = vpack.c.bf16 (!%p272_p10), %v349_v1, %v348_v0  ;;  %v351_v4 = vld [vmem:[%s4579_s3 + $0x18] sm:$0xff] (!%p272_p10)  ;;  %v729_v6 = vld [vmem:[%s4578_s2] sm:$0xff] (!%p272_p10)  ;;  %v730_v7 = vld [vmem:[%s4578_s2 + $0x8] sm:$0xff] (!%p272_p10)  ;;  %s3831_s8 = smov (!%p272_p10), 104   ;;  %vm1436_vm4 = vcmask (!%p272_p10), 130112  }
  0x10   : > { %v3061_v5 = vpack.c.bf16 (!%p272_p10), %v351_v4, %v350_v2  ;;  %v562_v8 = vld [vmem:[%s4580_s4] sm:$0xff] (!%p272_p10)  ;;  %v563_v9 = vld [vmem:[%s4580_s4 + $0x8] sm:$0xff] (!%p272_p10)  ;;  %v3073_v10 = vpack.c.bf16 (!%p272_p10), %v730_v7, %v729_v6  ;;  %v731_v13 = vld [vmem:[%s4578_s2 + $0x10] sm:$0xff] (!%p272_p10)  ;;  %s3832_s10 = smov (!%p272_p10), 8   ;;  %s3833_s12 = smov (!%p272_p10), 16   ;;  %vm1799_vm5 = vcmask (!%p272_p10), 195712  }
  0x11   : > { %3058 = vmatprep.subr.bf16.mxu0 (!%p272_p10), %v3057_v3  ;;  %3409 = vmatprep.subr.bf16.mxu1 (!%p272_p10), %v3057_v3  ;;  %v3065_v11 = vpack.c.bf16 (!%p272_p10), %v563_v9, %v562_v8  ;;  %v732_v14 = vld [vmem:[%s4578_s2 + $0x18] sm:$0xff] (!%p272_p10)  ;;  %v564_v15 = vld [vmem:[%s4580_s4 + $0x10] sm:$0xff] (!%p272_p10)  ;;  %vm4042_vm2 = vmpackc.low (!%p272_p10), %vm851_vm1, %vm851_vm1  ;;  %vm2162_vm6 = vcmask (!%p272_p10), 261312   ;;  %s2494_s18 = sshll.u32 (!%p272_p10), %s3818_s27, 8 }
  0x12   : > { %3060 = vmatpush3.bf16.msra.mxu0 (!%p272_p10), %v3057_v3  ;;  %3411 = vmatpush3.bf16.msra.mxu1 (!%p272_p10), %v3057_v3  ;;  %v565_v16 = vld [vmem:[%s4580_s4 + $0x18] sm:$0xff] (!%p272_p10)  ;;  %v3077_v22 = vpack.c.bf16 (!%p272_p10), %v732_v14, %v731_v13  ;;  %s4525_s21 = scalar_lea.hbm (!%p272_p10), %s4583_s7, %s2494_s18 }
  0x13   : > { %3062 = vmatprep.subr.bf16.mxu0 (!%p272_p10), %v3061_v5  ;;  %3410 = vmatprep.subr.bf16.mxu1 (!%p272_p10), %v3061_v5  ;;  %v3069_v23 = vpack.c.bf16 (!%p272_p10), %v565_v16, %v564_v15 }
  0x16   : > { %s3946_s23 = scalar_select %p313_p11, %s3818_s27, 1  ;;  %3064 = vmatpush3.bf16.msra.mxu0 %v3061_v5  ;;  %3412 = vmatpush3.bf16.msra.mxu1 %v3061_v5 }
  0x17   : > { %3074 = vmatprep.subr.bf16.mxu0 %v3073_v10  ;;  %3066 = vmatprep.subr.bf16.mxu1 %v3065_v11 }
  0x18   : > { %s2493_s19 = sshll.u32 %s3946_s23, 7 }
  0x19   : > { %s3964_s22 = scalar_lea.vmem %s4577_s1, %s2493_s19  ;;  %s2492_s19 = sshll.u32 %s3946_s23, 4 }
  0x1a   : > { %v332_v12 = vld [vmem:[%s3964_s22] sm:$0xff]  ;;  %v333_v17 = vld [vmem:[%s3964_s22 + $0x8] sm:$0xff]  ;;  %v334_v18 = vld [vmem:[%s3964_s22 + $0x10] sm:$0xff]  ;;  %s320_s30 = scalar_lea.vmem %s4576_s0, %s2492_s19  ;;  %s3828_s23 = smov 120  }
  0x1b   : > { %2699 = vmatprep.mubr.msk.f32.mxu0 %vm352_vm0, %v332_v12  ;;  %v342_v19 = vld [vmem:[%s3964_s22 + $0x50] sm:$0xff]  ;;  %v343_v20 = vld [vmem:[%s3964_s22 + $0x58] sm:$0xff]  ;;  %v344_v21 = vld [vmem:[%s3964_s22 + $0x60] sm:$0xff] }
  0x1c   : > { %2714 = vmatprep.mubr.msk.f32.mxu1 %vm352_vm0, %v342_v19  ;;  %2700 = vmatmul.mubr.msk.f32.vlgmr.msra.gmra.mrb[0].mxu0 %vm352_vm0, %v333_v17  ;;  %v335_v24 = vld [vmem:[%s3964_s22 + $0x18] sm:$0xff]  ;;  %v345_v25 = vld [vmem:[%s3964_s22 + $0x68] sm:$0xff]  ;;  %v336_v26 = vld [vmem:[%s3964_s22 + $0x20] sm:$0xff] }
  0x1d   : > { %2715 = vmatmul.mubr.msk.f32.vlgmr.msra.gmra.mrb[0].mxu1 %vm352_vm0, %v343_v20  ;;  %2702 = vmatprep.mubr.msk.f32.mxu0 %vm352_vm0, %v334_v18  ;;  %v346_v27 = vld [vmem:[%s3964_s22 + $0x70] sm:$0xff]  ;;  %v337_v28 = vld [vmem:[%s3964_s22 + $0x28] sm:$0xff]  ;;  %v347_v29 = vld [vmem:[%s3964_s22 + $0x78] sm:$0xff] }
  0x1e   : > { %2717 = vmatprep.mubr.msk.f32.mxu1 %vm352_vm0, %v344_v21  ;;  %3076 = vmatpush3.bf16.msra.mxu0 %v3073_v10  ;;  %v338_v30 = vld [vmem:[%s3964_s22 + $0x30] sm:$0xff]  ;;  %v339_v31 = vld [vmem:[%s3964_s22 + $0x38] sm:$0xff]  ;;  %v340_v32 = vld [vmem:[%s3964_s22 + $0x40] sm:$0xff] }
  0x1f   : > { %3068 = vmatpush3.bf16.msra.mxu1 %v3065_v11  ;;  %3078 = vmatprep.subr.bf16.mxu0 %v3077_v22  ;;  %v341_v33 = vld [vmem:[%s3964_s22 + $0x48] sm:$0xff]  ;;  %v727_v34 = vld [vmem:[%s320_s30] sm:$0xff]  ;;  %s3830_s22 = smov 112  }
  0x20   : > { %3070 = vmatprep.subr.bf16.mxu1 %v3069_v23  ;;  %2703 = vmatmul.mubr.msk.f32.gmra.mrb[2].mxu0 %vm352_vm0, %v335_v24  ;;  %v728_v35 = vld [vmem:[%s320_s30 + $0x8] sm:$0xff] }
  0x21   : > { %2718 = vmatmul.mubr.msk.f32.gmra.mrb[2].mxu1 %vm352_vm0, %v345_v25  ;;  %2705 = vmatprep.mubr.msk.f32.mxu0 %vm352_vm0, %v336_v26 }
  0x22   : > { %2720 = vmatprep.mubr.msk.f32.mxu1 %vm352_vm0, %v346_v27  ;;  %3080 = vmatpush3.bf16.msra.mxu0 %v3077_v22 }
  0x23   : > { %3072 = vmatpush3.bf16.msra.mxu1 %v3069_v23 }
  0x24   : > { %2706 = vmatmul.mubr.msk.f32.gmra.mrb[4].mxu0 %vm352_vm0, %v337_v28 }
  0x25   : > { %2721 = vmatmul.mubr.msk.f32.gmra.mrb[4].mxu1 %vm352_vm0, %v347_v29  ;;  %2708 = vmatprep.mubr.msk.f32.mxu0 %vm352_vm0, %v338_v30 }
  0x26   : > { %2731 = vmatprep.mubr.msk.f32.mxu1 %vm352_vm0, %v332_v12 }
  0x28   : > { %2709 = vmatmul.mubr.msk.f32.gmra.mrb[6].mxu0 %vm352_vm0, %v339_v31 }
  0x29   : > { %2732 = vmatmul.mubr.msk.f32.vlgmr.msra.gmra.mrb[6].mxu1 %vm352_vm0, %v333_v17  ;;  %2711 = vmatprep.mubr.msk.f32.mxu0 %vm352_vm0, %v340_v32 }
  0x2a   : > { %2734 = vmatprep.mubr.msk.f32.mxu1 %vm352_vm0, %v334_v18 }
  0x2c   : > { %2712 = vmatmul.mubr.msk.f32.gmra.mrb[8].mxu0 %vm352_vm0, %v341_v33 }
  0x2d   : > { %2735 = vmatmul.mubr.msk.f32.gmra.mrb[8].mxu1 %vm352_vm0, %v335_v24  ;;  %2763 = vmatprep.mubr.msk.f32.mxu0 %vm352_vm0, %v727_v34 }
  0x2e   : > { %2737 = vmatprep.mubr.msk.f32.mxu1 %vm352_vm0, %v336_v26 }
  0x30   : > { %2764 = vmatmul.mubr.msk.f32.vlgmr.msra.gmra.mrb[10].mxu0 %vm352_vm0, %v728_v35 }
  0x31   : > { %2738 = vmatmul.mubr.msk.f32.gmra.mrb[10].mxu1 %vm352_vm0, %v337_v28 }
  0x32   : > { %2740 = vmatprep.mubr.msk.f32.mxu1 %vm352_vm0, %v338_v30 }
  0x35   : > { %2741 = vmatmul.mubr.msk.f32.gmra.mrb[12].mxu1 %vm352_vm0, %v339_v31 }
  0x36   : > { %2743 = vmatprep.mubr.msk.f32.mxu1 %vm352_vm0, %v340_v32 }
  0x39   : > { %2744 = vmatmul.mubr.msk.f32.gmra.mrb[14].mxu1 %vm352_vm0, %v341_v33 }
  0x3a   : > { %2746 = vmatprep.mubr.msk.f32.mxu1 %vm352_vm0, %v342_v19 }
  0x3d   : > { %2747 = vmatmul.mubr.msk.f32.gmra.mrb[16].mxu1 %vm352_vm0, %v343_v20 }
  0x3e   : > { %2749 = vmatprep.mubr.msk.f32.mxu1 %vm352_vm0, %v344_v21 }
  0x41   : > { %2750 = vmatmul.mubr.msk.f32.gmra.mrb[18].mxu1 %vm352_vm0, %v345_v25 }
  0x42   : > { %2752 = vmatprep.mubr.msk.f32.mxu1 %vm352_vm0, %v346_v27 }
  0x45   : > { %2753 = vmatmul.mubr.msk.f32.gmra.mrb[20].mxu1 %vm352_vm0, %v347_v29 }
  0xef   : > { %v2701_v36 = vpop.f32.mrb[0].mxu0 }
  0xf0   : > { %v2716_v37 = vpop.f32.mrb[0].mxu1  ;;  %547 = vst.msk [vmem:[#allocation2 + $0x8] sm:$0xff] %vm352_vm0, %v2701_v36  ;;  %v467_v38 = vpop.f32.mrb[1].mxu0 }
  0xf1   : > { %557 = vst.msk [vmem:[#allocation2 + $0x58] sm:$0xff] %vm352_vm0, %v2716_v37  ;;  %v517_v39 = vpop.f32.mrb[1].mxu1  ;;  %546 = vst.msk [vmem:[#allocation2] sm:$0xff] %vm352_vm0, %v467_v38 }
  0xf2   : > { %556 = vst.msk [vmem:[#allocation2 + $0x50] sm:$0xff] %vm352_vm0, %v517_v39 }
  0xf3   : > { %v2704_v40 = vpop.f32.mrb[2].mxu0 }
  0xf4   : > { %v2719_v41 = vpop.f32.mrb[2].mxu1  ;;  %549 = vst.msk [vmem:[#allocation2 + $0x18] sm:$0xff] %vm352_vm0, %v2704_v40  ;;  %v477_v42 = vpop.f32.mrb[3].mxu0 }
  0xf5   : > { %559 = vst.msk [vmem:[#allocation2 + $0x68] sm:$0xff] %vm352_vm0, %v2719_v41  ;;  %v527_v43 = vpop.f32.mrb[3].mxu1  ;;  %548 = vst.msk [vmem:[#allocation2 + $0x10] sm:$0xff] %vm352_vm0, %v477_v42 }
  0xf6   : > { %558 = vst.msk [vmem:[#allocation2 + $0x60] sm:$0xff] %vm352_vm0, %v527_v43 }
  0xf7   : > { %v1077_v44 = vld [vmem:[#allocation2 + $0x8] sm:$0xff]  ;;  %v2707_v45 = vpop.f32.mrb[4].mxu0 }
  0xf8   : > { %v2722_v46 = vpop.f32.mrb[4].mxu1  ;;  %v1076_v47 = vld [vmem:[#allocation2] sm:$0xff]  ;;  %551 = vst.msk [vmem:[#allocation2 + $0x28] sm:$0xff] %vm352_vm0, %v2707_v45  ;;  %v487_v49 = vpop.f32.mrb[5].mxu0  ;;  %v4096_v16 = vld [vmem:[#allocation2 + $0x58] sm:$0xff] }
  0xf9   : > { %561 = vst.msk [vmem:[#allocation2 + $0x78] sm:$0xff] %vm352_vm0, %v2722_v46  ;;  %v537_v50 = vpop.f32.mrb[5].mxu1  ;;  %v4048_v51 = vpack.i.bf16 %v1077_v44, %v1076_v47  ;;  %v3081_v52 = vpack.c.bf16 %v1077_v44, %v1076_v47  ;;  %550 = vst.msk [vmem:[#allocation2 + $0x20] sm:$0xff] %vm352_vm0, %v487_v49  ;;  %v1086_v20 = vld [vmem:[#allocation2 + $0x50] sm:$0xff] }
  0xfa   : > { %560 = vst.msk [vmem:[#allocation2 + $0x70] sm:$0xff] %vm352_vm0, %v537_v50  ;;  %v4111_v26 = vpack.i.bf16 %v4096_v16, %v1086_v20 }
  0xfb   : > { %3477 = vrot.lane.b32.xlu1 %v4048_v51, %s3828_s23  ;;  %3083 = vmatprep.subr.msk.bf16.mxu1 %vm4042_vm2, %v3081_v52  ;;  %v1079_v53 = vld [vmem:[#allocation2 + $0x18] sm:$0xff]  ;;  %v2710_v54 = vpop.f32.mrb[6].mxu0 }
  0xfc   : > { %v2733_v55 = vpop.f32.mrb[6].mxu1  ;;  %3086 = vmatpush3.bf16.xpose.msk.msra.mxu1 %vm4042_vm2, %v3081_v52  ;;  %v1078_v56 = vld [vmem:[#allocation2 + $0x10] sm:$0xff]  ;;  %553 = vst.msk [vmem:[#allocation2 + $0x38] sm:$0xff] %vm352_vm0, %v2710_v54  ;;  %v497_v57 = vpop.f32.mrb[7].mxu0  ;;  %v1089_v30 = vld [vmem:[#allocation2 + $0x68] sm:$0xff] }
  0xfd   : > { %712 = vst.msk [vmem:[#allocation3 + $0x8] sm:$0xff] %vm352_vm0, %v2733_v55  ;;  %v632_v58 = vpop.f32.mrb[7].mxu1  ;;  %v4060_v59 = vpack.i.bf16 %v1079_v53, %v1078_v56  ;;  %v3087_v60 = vpack.c.bf16 %v1079_v53, %v1078_v56  ;;  %552 = vst.msk [vmem:[#allocation2 + $0x30] sm:$0xff] %vm352_vm0, %v497_v57  ;;  %v1088_v29 = vld [vmem:[#allocation2 + $0x60] sm:$0xff]  ;;  %v3111_v55 = vpack.c.bf16 %v4096_v16, %v1086_v20 }
  0xfe   : > { %711 = vst.msk [vmem:[#allocation3] sm:$0xff] %vm352_vm0, %v632_v58  ;;  %v4121_v34 = vpack.i.bf16 %v1089_v30, %v1088_v29 }
  0xff   : > { %3482 = vrot.lane.b32.xlu1 %v4060_v59, %s3828_s23  ;;  %3089 = vmatprep.subr.msk.bf16.mxu1 %vm4042_vm2, %v3087_v60  ;;  %v824_v61 = vld [vmem:[#allocation2 + $0x28] sm:$0xff]  ;;  %v2713_v62 = vpop.f32.mrb[8].mxu0 }
 0x100   : > { %v2736_v63 = vpop.f32.mrb[8].mxu1  ;;  %v823_v0 = vld [vmem:[#allocation2 + $0x20] sm:$0xff]  ;;  %555 = vst.msk [vmem:[#allocation2 + $0x48] sm:$0xff] %vm352_vm0, %v2713_v62  ;;  %v507_v1 = vpop.f32.mrb[9].mxu0  ;;  %v1091_v38 = vld [vmem:[#allocation2 + $0x78] sm:$0xff] }
 0x101   : > { %714 = vst.msk [vmem:[#allocation3 + $0x18] sm:$0xff] %vm352_vm0, %v2736_v63  ;;  %v642_v2 = vpop.f32.mrb[9].mxu1  ;;  %v3093_v3 = vpack.c.bf16 %v824_v61, %v823_v0  ;;  %554 = vst.msk [vmem:[#allocation2 + $0x40] sm:$0xff] %vm352_vm0, %v507_v1  ;;  %v4072_v4 = vpack.i.bf16 %v824_v61, %v823_v0  ;;  %v1090_v37 = vld [vmem:[#allocation2 + $0x70] sm:$0xff]  ;;  %v3117_v1 = vpack.c.bf16 %v1089_v30, %v1088_v29  ;;  %v815_v29 = vlaneseq }
 0x102   : > { %713 = vst.msk [vmem:[#allocation3 + $0x10] sm:$0xff] %vm352_vm0, %v642_v2  ;;  %v4133_v43 = vpack.i.bf16 %v1091_v38, %v1090_v37 }
 0x103   : > { %v1083_v5 = vld [vmem:[#allocation2 + $0x38] sm:$0xff]  ;;  %v4074_v6 = vpop.f32.mrb[10].mxu0  ;;  %v816_v30 = vand.u32 127, %v815_v29 }
 0x104   : > { %v2739_v7 = vpop.f32.mrb[10].mxu1  ;;  %v4076_v8 = vld [vmem:[#allocation3 + $0x8] sm:$0xff]  ;;  %3092 = vmatpush3.bf16.xpose.msk.msra.mxu1 %vm4042_vm2, %v3087_v60  ;;  %v1082_v9 = vld [vmem:[#allocation2 + $0x30] sm:$0xff]  ;;  %v4080_v10 = vpop.f32.mrb[11].mxu0 }
 0x105   : > { %716 = vst.msk [vmem:[#allocation3 + $0x28] sm:$0xff] %vm352_vm0, %v2739_v7  ;;  %v652_v11 = vpop.f32.mrb[11].mxu1  ;;  %v4083_v12 = vld [vmem:[#allocation3] sm:$0xff]  ;;  %3095 = vmatprep.subr.msk.bf16.mxu1 %vm4042_vm2, %v3093_v3  ;;  %v4087_v13 = vpack.i.bf16 %v1083_v5, %v1082_v9  ;;  %2798 = vmatprep.mubr.msk.f32.mxu1 %vm851_vm1, %v4080_v10  ;;  %v3099_v23 = vpack.c.bf16 %v1083_v5, %v1082_v9  ;;  %vm817_vm3 = vcmp.lt.s32.totalorder %v816_v30, 8 }
 0x106   : > { %715 = vst.msk [vmem:[#allocation3 + $0x20] sm:$0xff] %vm352_vm0, %v652_v11  ;;  %v3129_v14 = vpack.c.bf16 %v4076_v8, %v4083_v12  ;;  %v4156_v58 = vpack.i.bf16 %v4076_v8, %v4083_v12  ;;  %v3123_v5 = vpack.c.bf16 %v1091_v38, %v1090_v37 }
 0x107   : > { %3492 = vrot.lane.b32.xlu1 %v4087_v13, %s3828_s23  ;;  %v1085_v15 = vld [vmem:[#allocation2 + $0x48] sm:$0xff] }
 0x108   : > { %v2742_v17 = vpop.f32.mrb[12].mxu1  ;;  %3130 = vmatprep.subr.bf16.mxu0 %v3129_v14  ;;  %v4098_v18 = vld [vmem:[#allocation3 + $0x18] sm:$0xff]  ;;  %v1084_v19 = vld [vmem:[#allocation2 + $0x40] sm:$0xff] }
 0x109   : > { %718 = vst.msk [vmem:[#allocation3 + $0x38] sm:$0xff] %vm352_vm0, %v2742_v17  ;;  %v662_v21 = vpop.f32.mrb[13].mxu1  ;;  %3132 = vmatpush3.bf16.msra.mxu0 %v3129_v14  ;;  %v4101_v22 = vld [vmem:[#allocation3 + $0x10] sm:$0xff]  ;;  %v4103_v24 = vpack.i.bf16 %v1085_v15, %v1084_v19  ;;  %v3105_v41 = vpack.c.bf16 %v1085_v15, %v1084_v19 }
 0x10a   : > { %717 = vst.msk [vmem:[#allocation3 + $0x30] sm:$0xff] %vm352_vm0, %v662_v21  ;;  %v3133_v25 = vpack.c.bf16 %v4098_v18, %v4101_v22 }
 0x10b   : > { %3497 = vrot.lane.b32.xlu1 %v4103_v24, %s3828_s23 }
 0x10c   : > { %v2745_v27 = vpop.f32.mrb[14].mxu1  ;;  %3134 = vmatprep.subr.bf16.mxu0 %v3133_v25  ;;  %v840_v28 = vld [vmem:[#allocation3 + $0x28] sm:$0xff]  ;;  %3098 = vmatpush3.bf16.xpose.msk.msra.mxu1 %vm4042_vm2, %v3093_v3 }
 0x10d   : > { %720 = vst.msk [vmem:[#allocation3 + $0x48] sm:$0xff] %vm352_vm0, %v2745_v27  ;;  %v672_v31 = vpop.f32.mrb[15].mxu1  ;;  %3136 = vmatpush3.bf16.msra.mxu0 %v3133_v25  ;;  %v839_v32 = vld [vmem:[#allocation3 + $0x20] sm:$0xff]  ;;  %3101 = vmatprep.subr.msk.bf16.mxu1 %vm4042_vm2, %v3099_v23 }
 0x10e   : > { %719 = vst.msk [vmem:[#allocation3 + $0x40] sm:$0xff] %vm352_vm0, %v672_v31  ;;  %v3137_v33 = vpack.c.bf16 %v840_v28, %v839_v32  ;;  %v4166_v63 = vpack.i.bf16 %v840_v28, %v839_v32  ;;  %v3829_v31 = vmov -1e+30  }
 0x10f   : > { %3502 = vrot.lane.b32.xlu1 %v4111_v26, %s3828_s23  ;;  %v4206_v32 = vsel %vm817_vm3, 0.0, %v3829_v31 }
 0x110   : > { %v2748_v35 = vpop.f32.mrb[16].mxu1  ;;  %3138 = vmatprep.subr.bf16.mxu0 %v3137_v33  ;;  %v4123_v36 = vld [vmem:[#allocation3 + $0x38] sm:$0xff] }
 0x111   : > { %722 = vst.msk [vmem:[#allocation3 + $0x58] sm:$0xff] %vm352_vm0, %v2748_v35  ;;  %v682_v39 = vpop.f32.mrb[17].mxu1  ;;  %3140 = vmatpush3.bf16.msra.mxu0 %v3137_v33  ;;  %v4126_v40 = vld [vmem:[#allocation3 + $0x30] sm:$0xff] }
 0x112   : > { %721 = vst.msk [vmem:[#allocation3 + $0x50] sm:$0xff] %vm352_vm0, %v682_v39  ;;  %v3141_v42 = vpack.c.bf16 %v4123_v36, %v4126_v40  ;;  %v4216_v39 = vpack.i.bf16 %v4098_v18, %v4101_v22 }
 0x113   : > { %3507 = vrot.lane.b32.xlu1 %v4121_v34, %s3828_s23 }
 0x114   : > { %v2751_v44 = vpop.f32.mrb[18].mxu1  ;;  %3142 = vmatprep.subr.bf16.mxu0 %v3141_v42  ;;  %v844_v45 = vld [vmem:[#allocation3 + $0x48] sm:$0xff]  ;;  %3104 = vmatpush3.bf16.xpose.msk.msra.mxu1 %vm4042_vm2, %v3099_v23 }
 0x115   : > { %724 = vst.msk [vmem:[#allocation3 + $0x68] sm:$0xff] %vm352_vm0, %v2751_v44  ;;  %v692_v46 = vpop.f32.mrb[19].mxu1  ;;  %3144 = vmatpush3.bf16.msra.mxu0 %v3141_v42  ;;  %v843_v47 = vld [vmem:[#allocation3 + $0x40] sm:$0xff]  ;;  %3107 = vmatprep.subr.msk.bf16.mxu1 %vm4042_vm2, %v3105_v41 }
 0x116   : > { %723 = vst.msk [vmem:[#allocation3 + $0x60] sm:$0xff] %vm352_vm0, %v692_v46  ;;  %v3145_v49 = vpack.c.bf16 %v844_v45, %v843_v47  ;;  %v4174_v3 = vpack.i.bf16 %v844_v45, %v843_v47 }
 0x117   : > { %3512 = vrot.lane.b32.xlu1 %v4133_v43, %s3828_s23 }
 0x118   : > { %v2754_v50 = vpop.f32.mrb[20].mxu1  ;;  %3146 = vmatprep.subr.bf16.mxu0 %v3145_v49  ;;  %v4143_v52 = vld [vmem:[#allocation3 + $0x58] sm:$0xff] }
 0x119   : > { %726 = vst.msk [vmem:[#allocation3 + $0x78] sm:$0xff] %vm352_vm0, %v2754_v50  ;;  %v702_v53 = vpop.f32.mrb[21].mxu1  ;;  %3148 = vmatpush3.bf16.msra.mxu0 %v3145_v49  ;;  %v4146_v54 = vld [vmem:[#allocation3 + $0x50] sm:$0xff] }
 0x11a   : > { %725 = vst.msk [vmem:[#allocation3 + $0x70] sm:$0xff] %vm352_vm0, %v702_v53  ;;  %v3149_v56 = vpack.c.bf16 %v4143_v52, %v4146_v54  ;;  %v4228_v42 = vpack.i.bf16 %v4143_v52, %v4146_v54 }
 0x11b   : > { %1108 = vrot.lane.b32.xlu1 %v4080_v10, %s3828_s23 }
 0x11c   : > { %3150 = vmatprep.subr.bf16.mxu0 %v3149_v56  ;;  %v848_v57 = vld [vmem:[#allocation3 + $0x68] sm:$0xff]  ;;  %3110 = vmatpush3.bf16.xpose.msk.msra.mxu1 %vm4042_vm2, %v3105_v41  ;;  %v4222_v41 = vpack.i.bf16 %v4123_v36, %v4126_v40 }
 0x11d   : > { %3152 = vmatpush3.bf16.msra.mxu0 %v3149_v56  ;;  %v847_v60 = vld [vmem:[#allocation3 + $0x60] sm:$0xff]  ;;  %3113 = vmatprep.subr.msk.bf16.mxu1 %vm4042_vm2, %v3111_v55 }
 0x11e   : > { %v3153_v61 = vpack.c.bf16 %v848_v57, %v847_v60  ;;  %v4192_v12 = vpack.i.bf16 %v848_v57, %v847_v60 }
 0x11f   : > { %3517 = vrot.lane.b32.xlu1 %v4156_v58, %s3828_s23 }
 0x120   : > { %3154 = vmatprep.subr.bf16.mxu0 %v3153_v61  ;;  %v4162_v62 = vld [vmem:[#allocation3 + $0x78] sm:$0xff] }
 0x121   : > { %3156 = vmatpush3.bf16.msra.mxu0 %v3153_v61  ;;  %v4168_v0 = vld [vmem:[#allocation3 + $0x70] sm:$0xff] }
 0x122   : > { %v3157_v2 = vpack.c.bf16 %v4162_v62, %v4168_v0  ;;  %v1832_v48 = vld [vmem:[#allocation3 + $0x70] sm:$0xff] }
 0x123   : > { %3527 = vrot.lane.b32.xlu1 %v4166_v63, %s3828_s23 }
 0x124   : > { %3158 = vmatprep.subr.bf16.mxu0 %v3157_v2  ;;  %3116 = vmatpush3.bf16.xpose.msk.msra.mxu1 %vm4042_vm2, %v3111_v55 }
 0x125   : > { %3160 = vmatpush3.bf16.msra.mxu0 %v3157_v2  ;;  %3119 = vmatprep.subr.msk.bf16.mxu1 %vm4042_vm2, %v3117_v1 }
 0x127   : > { %3537 = vrot.lane.b32.xlu1 %v4174_v3, %s3828_s23 }
 0x12b   : > { %3547 = vrot.lane.b32.xlu1 %v4192_v12, %s3828_s23 }
 0x12c   : > { %3122 = vmatpush3.bf16.xpose.msk.msra.mxu1 %vm4042_vm2, %v3117_v1 }
 0x12d   : > { %3125 = vmatprep.subr.msk.bf16.mxu1 %vm4042_vm2, %v3123_v5 }
 0x134   : > { %3128 = vmatpush3.bf16.xpose.msk.msra.mxu1 %vm4042_vm2, %v3123_v5 }
 0x13b   : > { %2799 = vmatmul.mubr.msk.f32.vlgmr.msra.gmra.mrb[22].mxu1 %vm851_vm1, %v4074_v6 }
 0x16d   : > { %v3478_v7 = vpop.permute.xlu1 %3477 }
 0x16e   : > { %v3480_v8 = vunpack.i.h.bf16 %v3478_v7  ;;  %v3479_v9 = vunpack.i.l.bf16 %v3478_v7 }
 0x170   : > { %v3161_v11 = vpack.c.bf16 %v3480_v8, %v3479_v9 }
 0x171   : > { %v3483_v14 = vpop.permute.xlu1 %3482 }
 0x172   : > { %3163 = vmatprep.subr.msk.bf16.mxu0 %vm4042_vm2, %v3161_v11  ;;  %v3485_v53 = vunpack.i.h.bf16 %v3483_v14  ;;  %v3484_v52 = vunpack.i.l.bf16 %v3483_v14 }
 0x174   : > { %v3167_v2 = vpack.c.bf16 %v3485_v53, %v3484_v52 }
 0x179   : > { %v4196_v15 = vpop.permute.xlu1 %3492 }
 0x17d   : > { %v4198_v16 = vpop.permute.xlu1 %3497 }
 0x181   : > { %v4200_v17 = vpop.permute.xlu1 %3502 }
 0x182   : > { %v3504_v53 = vunpack.i.l.bf16 %v4200_v17 }
 0x185   : > { %v4202_v19 = vpop.permute.xlu1 %3507 }
 0x189   : > { %v4204_v20 = vpop.permute.xlu1 %3512 }
 0x18d   : > { %v1109_v21 = vpop.permute.xlu1 %1108 }
 0x191   : > { %v3518_v23 = vpop.permute.xlu1 %3517 }
 0x192   : > { %v3520_v25 = vunpack.i.h.bf16 %v3518_v23  ;;  %v3519_v27 = vunpack.i.l.bf16 %v3518_v23 }
 0x194   : > { %v3209_v28 = vpack.c.bf16 %v3520_v25, %v3519_v27 }
 0x195   : > { %v3528_v50 = vpop.permute.xlu1 %3527 }
 0x196   : > { %3210 = vmatprep.subr.bf16.mxu1 %v3209_v28  ;;  %v3530_v57 = vunpack.i.h.bf16 %v3528_v50  ;;  %v3529_v60 = vunpack.i.l.bf16 %v3528_v50  ;;  %v3505_v50 = vunpack.i.h.bf16 %v4200_v17  ;;  %v3515_v17 = vunpack.i.h.bf16 %v4204_v20 }
 0x197   : > { %3212 = vmatpush3.bf16.msra.mxu1 %v3209_v28 }
 0x198   : > { %v3217_v7 = vpack.c.bf16 %v3530_v57, %v3529_v60  ;;  %v3191_v52 = vpack.c.bf16 %v3505_v50, %v3504_v53 }
 0x199   : > { %v3538_v14 = vpop.permute.xlu1 %3537 }
 0x19a   : > { %v3540_v27 = vunpack.i.h.bf16 %v3538_v14  ;;  %v3539_v28 = vunpack.i.l.bf16 %v3538_v14 }
 0x20e   : > { %v2800_v33 = vpop.f32.mrb[22].mxu1 }
 0x20f   : > { %v972_v35 = vpop.f32.mrb[23].mxu1  ;;  %v978_v38 = vadd.f32 %v2800_v33, %v4206_v32 }
 0x210   : > { %v973_v37 = vadd.f32 %v972_v35, %v4206_v32  ;;  %v3548_v35 = vpop.permute.xlu1 %3547 }
 0x212   : > { %981 = vmax.xlane.f32.xlu0 %v973_v37 }
 0x216   : > { %983 = vmax.xlane.f32.xlu0 %v978_v38 }
 0x22c   : > { %3487 = vrot.lane.b32.xlu0 %v4072_v4, %s3828_s23 }
 0x230   : > { %1110 = vrot.lane.b32.xlu0 %v4074_v6, %s3828_s23 }
 0x234   : > { %3522 = vrot.lane.b32.xlu0 %v4216_v39, %s3828_s23 }
 0x238   : > { %3532 = vrot.lane.b32.xlu0 %v4222_v41, %s3828_s23 }
 0x23c   : > { %3542 = vrot.lane.b32.xlu0 %v4228_v42, %s3828_s23 }
 0x29f   : > { %v982_v44 = vpop.xlane.xlu0 %981 }
 0x2a0   : > { %v985_v18 = vsub.f32 %v973_v37, %v982_v44  ;;  %v3495_v37 = vunpack.i.h.bf16 %v4196_v15  ;;  %v3550_v44 = vunpack.i.h.bf16 %v3548_v35 }
 0x2a2   : > { %v987_v22 = vmul.f32 1.442695, %v985_v18  ;;  %v3549_v18 = vunpack.i.l.bf16 %v3548_v35 }
 0x2a3   : > { %v984_v45 = vpop.xlane.xlu0 %983 }
 0x2a4   : > { %3716 = vpow2.f32 %v987_v22  ;;  %v986_v46 = vsub.f32 %v978_v38, %v984_v45  ;;  %v3494_v38 = vunpack.i.l.bf16 %v4196_v15 }
 0x2a6   : > { %v989_v47 = vmul.f32 1.442695, %v986_v46  ;;  %v3179_v45 = vpack.c.bf16 %v3495_v37, %v3494_v38  ;;  %v3233_v46 = vpack.c.bf16 %v3550_v44, %v3549_v18 }
 0x2a7   : > { %v3488_v49 = vpop.permute.xlu0 %3487 }
 0x2a8   : > { %3718 = vpow2.f32 %v989_v47  ;;  %v3490_v23 = vunpack.i.h.bf16 %v3488_v49  ;;  %v3489_v25 = vunpack.i.l.bf16 %v3488_v49  ;;  %v3500_v47 = vunpack.i.h.bf16 %v4198_v16 }
 0x2a9   : > { %v3499_v49 = vunpack.i.l.bf16 %v4198_v16  ;;  %v3510_v16 = vunpack.i.h.bf16 %v4202_v19 }
 0x2ab   : > { %v4232_v36 = vpop.permute.xlu0 %1110  ;;  %v3185_v15 = vpack.c.bf16 %v3500_v47, %v3499_v49 }
 0x2ae   : > { %v4234_v40 = vpop.eup %3716 }
 0x2af   : > { %2833 = vmatprep.mubr.f32.mxu0 %v4234_v40  ;;  %v3523_v54 = vpop.permute.xlu0 %3522 }
 0x2b0   : > { %v3525_v55 = vunpack.i.h.bf16 %v3523_v54  ;;  %v3524_v56 = vunpack.i.l.bf16 %v3523_v54  ;;  %v3509_v54 = vunpack.i.l.bf16 %v4202_v19 }
 0x2b2   : > { %v4237_v61 = vpop.eup %3718  ;;  %v3213_v1 = vpack.c.bf16 %v3525_v55, %v3524_v56  ;;  %v3197_v55 = vpack.c.bf16 %v3510_v16, %v3509_v54  ;;  %v3514_v56 = vunpack.i.l.bf16 %v4204_v20 }
 0x2b3   : > { %2834 = vmatmul.mubr.f32.vlgmr.msra.gmra.mrb[12].mxu0 %v4237_v61  ;;  %v3533_v5 = vpop.permute.xlu0 %3532 }
 0x2b4   : > { %3166 = vmatpush3.bf16.xpose.msk.msra.mxu0 %vm4042_vm2, %v3161_v11  ;;  %2868 = vmatprep.mubr.msk.f32.mxu0 %vm851_vm1, %v1109_v21  ;;  %v3535_v8 = vunpack.i.h.bf16 %v3533_v5  ;;  %v3534_v9 = vunpack.i.l.bf16 %v3533_v5  ;;  %v3173_v11 = vpack.c.bf16 %v3490_v23, %v3489_v25  ;;  %v3225_v21 = vpack.c.bf16 %v3540_v27, %v3539_v28 }
 0x2b5   : > { %3169 = vmatprep.subr.msk.bf16.mxu0 %vm4042_vm2, %v3167_v2  ;;  %3214 = vmatprep.subr.bf16.mxu1 %v3213_v1  ;;  %v3203_v57 = vpack.c.bf16 %v3515_v17, %v3514_v56 }
 0x2b6   : > { %3216 = vmatpush3.bf16.msra.mxu1 %v3213_v1  ;;  %v3221_v29 = vpack.c.bf16 %v3535_v8, %v3534_v9 }
 0x2b7   : > { %3218 = vmatprep.subr.bf16.mxu1 %v3217_v7  ;;  %v3543_v30 = vpop.permute.xlu0 %3542 }
 0x2b8   : > { %v3545_v31 = vunpack.i.h.bf16 %v3543_v30  ;;  %v3544_v33 = vunpack.i.l.bf16 %v3543_v30 }
 0x2ba   : > { %3220 = vmatpush3.bf16.msra.mxu1 %v3217_v7  ;;  %v3229_v22 = vpack.c.bf16 %v3545_v31, %v3544_v33 }
 0x2bb   : > { %3222 = vmatprep.subr.bf16.mxu1 %v3221_v29 }
 0x2bc   : > { %3172 = vmatpush3.bf16.xpose.msk.msra.mxu0 %vm4042_vm2, %v3167_v2 }
 0x2bd   : > { %3175 = vmatprep.subr.msk.bf16.mxu0 %vm4042_vm2, %v3173_v11 }
 0x2be   : > { %3224 = vmatpush3.bf16.msra.mxu1 %v3221_v29 }
 0x2bf   : > { %3226 = vmatprep.subr.bf16.mxu1 %v3225_v21 }
 0x2c2   : > { %3228 = vmatpush3.bf16.msra.mxu1 %v3225_v21 }
 0x2c3   : > { %3230 = vmatprep.subr.bf16.mxu1 %v3229_v22 }
 0x2c4   : > { %3178 = vmatpush3.bf16.xpose.msk.msra.mxu0 %vm4042_vm2, %v3173_v11 }
 0x2c5   : > { %3181 = vmatprep.subr.msk.bf16.mxu0 %vm4042_vm2, %v3179_v45 }
 0x2c6   : > { %3232 = vmatpush3.bf16.msra.mxu1 %v3229_v22 }
 0x2c7   : > { %3234 = vmatprep.subr.bf16.mxu1 %v3233_v46 }
 0x2ca   : > { %3236 = vmatpush3.bf16.msra.mxu1 %v3233_v46 }
 0x2cc   : > { %3184 = vmatpush3.bf16.xpose.msk.msra.mxu0 %vm4042_vm2, %v3179_v45 }
 0x2cd   : > { %3187 = vmatprep.subr.msk.bf16.mxu0 %vm4042_vm2, %v3185_v15 }
 0x2d4   : > { %3190 = vmatpush3.bf16.xpose.msk.msra.mxu0 %vm4042_vm2, %v3185_v15 }
 0x2d5   : > { %3193 = vmatprep.subr.msk.bf16.mxu0 %vm4042_vm2, %v3191_v52 }
 0x2dc   : > { %3196 = vmatpush3.bf16.xpose.msk.msra.mxu0 %vm4042_vm2, %v3191_v52 }
 0x2dd   : > { %3199 = vmatprep.subr.msk.bf16.mxu0 %vm4042_vm2, %v3197_v55 }
 0x2e4   : > { %3202 = vmatpush3.bf16.xpose.msk.msra.mxu0 %vm4042_vm2, %v3197_v55 }
 0x2e5   : > { %3205 = vmatprep.subr.msk.bf16.mxu0 %vm4042_vm2, %v3203_v57 }
 0x2ec   : > { %3208 = vmatpush3.bf16.xpose.msk.msra.mxu0 %vm4042_vm2, %v3203_v57 }
 0x2f3   : > { %2869 = vmatmul.mubr.msk.f32.vlgmr.msra.gmra.mrb[14].mxu0 %vm851_vm1, %v4232_v36  ;;  %v4295_v36 = vpack.i.bf16 %v4162_v62, %v4168_v0 }
 0x386   : > { %v4283_v19 = vpop.f32.mrb[12].mxu0 }
 0x387   : > { %v4285_v60 = vpop.f32.mrb[13].mxu0 }
 0x3c6   : > { %v2870_v1 = vpop.f32.mrb[14].mxu0 }
 0x3c7   : > { %v1268_v20 = vadd.f32 %v2870_v1, %v4206_v32  ;;  %v1262_v2 = vpop.f32.mrb[15].mxu0 }
 0x3c8   : > { %v1263_v5 = vadd.f32 %v1262_v2, %v4206_v32 }
 0x3c9   : > { %1273 = vmax.xlane.f32.xlu1 %v1268_v20 }
 0x3ca   : > { %1271 = vmax.xlane.f32.xlu0 %v1263_v5 }
 0x3da   : > { %3557 = vrot.lane.b32.xlu1 %v4048_v51, %s3830_s22 }
 0x3de   : > { %3567 = vrot.lane.b32.xlu1 %v4072_v4, %s3830_s22 }
 0x3e0   : > { %3552 = vrot.lane.b32.xlu0 %v4295_v36, %s3828_s23  ;;  %s3834_s23 = smov 24  }
 0x3e2   : > { %3577 = vrot.lane.b32.xlu1 %v4103_v24, %s3830_s22 }
 0x3e4   : > { %3562 = vrot.lane.b32.xlu0 %v4060_v59, %s3830_s22 }
 0x3e6   : > { %3587 = vrot.lane.b32.xlu1 %v4121_v34, %s3830_s22 }
 0x3e8   : > { %3572 = vrot.lane.b32.xlu0 %v4087_v13, %s3830_s22 }
 0x3ea   : > { %1471 = vrot.lane.b32.xlu1 %v4080_v10, %s3830_s22 }
 0x3ec   : > { %3582 = vrot.lane.b32.xlu0 %v4111_v26, %s3830_s22 }
 0x3ee   : > { %3597 = vrot.lane.b32.xlu1 %v4156_v58, %s3830_s22 }
 0x3f0   : > { %3592 = vrot.lane.b32.xlu0 %v4133_v43, %s3830_s22 }
 0x3f2   : > { %3607 = vrot.lane.b32.xlu1 %v4166_v63, %s3830_s22 }
 0x3f4   : > { %1473 = vrot.lane.b32.xlu0 %v4074_v6, %s3830_s22 }
 0x3f6   : > { %3617 = vrot.lane.b32.xlu1 %v4174_v3, %s3830_s22 }
 0x3f8   : > { %3602 = vrot.lane.b32.xlu0 %v4216_v39, %s3830_s22 }
 0x3fa   : > { %3627 = vrot.lane.b32.xlu1 %v4192_v12, %s3830_s22 }
 0x3fc   : > { %3612 = vrot.lane.b32.xlu0 %v4222_v41, %s3830_s22 }
 0x400   : > { %3622 = vrot.lane.b32.xlu0 %v4228_v42, %s3830_s22 }
 0x456   : > { %v1274_v51 = vpop.xlane.xlu1 %1273 }
 0x457   : > { %v1276_v59 = vsub.f32 %v1268_v20, %v1274_v51  ;;  %v1272_v62 = vpop.xlane.xlu0 %1271 }
 0x458   : > { %v1275_v0 = vsub.f32 %v1263_v5, %v1272_v62 }
 0x459   : > { %v1279_v7 = vmul.f32 1.442695, %v1276_v59 }
 0x45a   : > { %v1277_v8 = vmul.f32 1.442695, %v1275_v0  ;;  %v3558_v9 = vpop.permute.xlu1 %3557 }
 0x45b   : > { %v3560_v14 = vunpack.i.h.bf16 %v3558_v9  ;;  %v3553_v23 = vpop.permute.xlu0 %3552  ;;  %v3559_v25 = vunpack.i.l.bf16 %v3558_v9 }
 0x45c   : > { %3720 = vpow2.f32 %v1277_v8  ;;  %v3555_v27 = vunpack.i.h.bf16 %v3553_v23  ;;  %v3554_v28 = vunpack.i.l.bf16 %v3553_v23 }
 0x45d   : > { %3722 = vpow2.f32 %v1279_v7  ;;  %v3241_v11 = vpack.c.bf16 %v3560_v14, %v3559_v25 }
 0x45e   : > { %v3237_v12 = vpack.c.bf16 %v3555_v27, %v3554_v28  ;;  %v3568_v29 = vpop.permute.xlu1 %3567 }
 0x45f   : > { %v3563_v30 = vpop.permute.xlu0 %3562  ;;  %v3570_v47 = vunpack.i.h.bf16 %v3568_v29  ;;  %v3569_v49 = vunpack.i.l.bf16 %v3568_v29 }
 0x460   : > { %3238 = vmatprep.subr.bf16.mxu1 %v3237_v12  ;;  %v3565_v33 = vunpack.i.h.bf16 %v3563_v30  ;;  %v3564_v35 = vunpack.i.l.bf16 %v3563_v30 }
 0x461   : > { %3240 = vmatpush3.bf16.msra.mxu1 %v3237_v12  ;;  %v3253_v16 = vpack.c.bf16 %v3570_v47, %v3569_v49 }
 0x462   : > { %v3578_v21 = vpop.permute.xlu1 %3577  ;;  %3243 = vmatprep.subr.msk.bf16.mxu1 %vm4042_vm2, %v3241_v11  ;;  %v3247_v22 = vpack.c.bf16 %v3565_v33, %v3564_v35 }
 0x463   : > { %v3573_v31 = vpop.permute.xlu0 %3572  ;;  %v3580_v27 = vunpack.i.h.bf16 %v3578_v21  ;;  %v3579_v28 = vunpack.i.l.bf16 %v3578_v21 }
 0x464   : > { %v3575_v2 = vunpack.i.h.bf16 %v3573_v31  ;;  %v3574_v5 = vunpack.i.l.bf16 %v3573_v31 }
 0x465   : > { %v3265_v31 = vpack.c.bf16 %v3580_v27, %v3579_v28 }
 0x466   : > { %v4331_v37 = vpop.eup %3720  ;;  %v4333_v38 = vpop.permute.xlu1 %3587  ;;  %v3259_v8 = vpack.c.bf16 %v3575_v2, %v3574_v5  ;;  %v1803_v2 = vld [vmem:[#allocation2 + $0x8] sm:$0xff] }
 0x467   : > { %v4335_v44 = vpop.eup %3722  ;;  %2903 = vmatprep.mubr.f32.mxu1 %v4331_v37  ;;  %v4338_v18 = vpop.permute.xlu0 %3582 }
 0x468   : > { %2904 = vmatmul.mubr.f32.vlgmr.msra.gmra.mrb[24].mxu1 %v4335_v44  ;;  %v3585_v21 = vunpack.i.h.bf16 %v4338_v18  ;;  %v3584_v47 = vunpack.i.l.bf16 %v4338_v18 }
 0x46a   : > { %v1472_v45 = vpop.permute.xlu1 %1471  ;;  %3246 = vmatpush3.bf16.xpose.msk.msra.mxu1 %vm4042_vm2, %v3241_v11 }
 0x46b   : > { %v4343_v46 = vpop.permute.xlu0 %3592  ;;  %3249 = vmatprep.subr.msk.bf16.mxu1 %vm4042_vm2, %v3247_v22  ;;  %2938 = vmatprep.mubr.msk.f32.mxu1 %vm851_vm1, %v1472_v45 }
 0x46c   : > { %v3595_v18 = vunpack.i.h.bf16 %v4343_v46 }
 0x46e   : > { %v3598_v15 = vpop.permute.xlu1 %3597 }
 0x46f   : > { %v3600_v50 = vunpack.i.h.bf16 %v3598_v15  ;;  %v3599_v53 = vunpack.i.l.bf16 %v3598_v15  ;;  %v4348_v52 = vpop.permute.xlu0 %1473  ;;  %v3271_v15 = vpack.c.bf16 %v3585_v21, %v3584_v47 }
 0x471   : > { %v3289_v54 = vpack.c.bf16 %v3600_v50, %v3599_v53  ;;  %v3590_v50 = vunpack.i.h.bf16 %v4333_v38  ;;  %v3589_v53 = vunpack.i.l.bf16 %v4333_v38 }
 0x472   : > { %v3608_v55 = vpop.permute.xlu1 %3607  ;;  %3252 = vmatpush3.bf16.xpose.msk.msra.mxu1 %vm4042_vm2, %v3247_v22 }
 0x473   : > { %3290 = vmatprep.subr.bf16.mxu0 %v3289_v54  ;;  %v3603_v17 = vpop.permute.xlu0 %3602  ;;  %3255 = vmatprep.subr.msk.bf16.mxu1 %vm4042_vm2, %v3253_v16  ;;  %v3610_v56 = vunpack.i.h.bf16 %v3608_v55  ;;  %v3609_v57 = vunpack.i.l.bf16 %v3608_v55 }
 0x474   : > { %v3605_v1 = vunpack.i.h.bf16 %v3603_v17  ;;  %v3604_v20 = vunpack.i.l.bf16 %v3603_v17  ;;  %3292 = vmatpush3.bf16.msra.mxu0 %v3289_v54  ;;  %v3594_v54 = vunpack.i.l.bf16 %v4343_v46 }
 0x475   : > { %v3297_v62 = vpack.c.bf16 %v3610_v56, %v3609_v57 }
 0x476   : > { %v3293_v51 = vpack.c.bf16 %v3605_v1, %v3604_v20  ;;  %v3618_v9 = vpop.permute.xlu1 %3617  ;;  %v3283_v55 = vpack.c.bf16 %v3595_v18, %v3594_v54  ;;  %v1802_v20 = vld [vmem:[#allocation2] sm:$0xff] }
 0x477   : > { %v3613_v59 = vpop.permute.xlu0 %3612  ;;  %v3620_v14 = vunpack.i.h.bf16 %v3618_v9  ;;  %v3619_v23 = vunpack.i.l.bf16 %v3618_v9  ;;  %v3636_v5 = vpack.i.bf16 %v1803_v2, %v1802_v20 }
 0x478   : > { %v3615_v0 = vunpack.i.h.bf16 %v3613_v59  ;;  %v3614_v7 = vunpack.i.l.bf16 %v3613_v59  ;;  %3294 = vmatprep.subr.bf16.mxu0 %v3293_v51 }
 0x479   : > { %3296 = vmatpush3.bf16.msra.mxu0 %v3293_v51  ;;  %v3305_v29 = vpack.c.bf16 %v3620_v14, %v3619_v23  ;;  %v1805_v51 = vld [vmem:[#allocation2 + $0x18] sm:$0xff] }
 0x47a   : > { %3258 = vmatpush3.bf16.xpose.msk.msra.mxu1 %vm4042_vm2, %v3253_v16  ;;  %3298 = vmatprep.subr.bf16.mxu0 %v3297_v62  ;;  %v3301_v25 = vpack.c.bf16 %v3615_v0, %v3614_v7  ;;  %v3628_v33 = vpop.permute.xlu1 %3627  ;;  %v3277_v16 = vpack.c.bf16 %v3590_v50, %v3589_v53 }
 0x47b   : > { %3261 = vmatprep.subr.msk.bf16.mxu1 %vm4042_vm2, %v3259_v8  ;;  %v3623_v12 = vpop.permute.xlu0 %3622  ;;  %v3630_v35 = vunpack.i.h.bf16 %v3628_v33  ;;  %v3629_v22 = vunpack.i.l.bf16 %v3628_v33 }
 0x47c   : > { %v3625_v30 = vunpack.i.h.bf16 %v3623_v12  ;;  %v3624_v11 = vunpack.i.l.bf16 %v3623_v12 }
 0x47d   : > { %3300 = vmatpush3.bf16.msra.mxu0 %v3297_v62  ;;  %v3313_v49 = vpack.c.bf16 %v3630_v35, %v3629_v22 }
 0x47e   : > { %3302 = vmatprep.subr.bf16.mxu0 %v3301_v25  ;;  %v3309_v45 = vpack.c.bf16 %v3625_v30, %v3624_v11 }
 0x481   : > { %3304 = vmatpush3.bf16.msra.mxu0 %v3301_v25 }
 0x482   : > { %3264 = vmatpush3.bf16.xpose.msk.msra.mxu1 %vm4042_vm2, %v3259_v8  ;;  %3306 = vmatprep.subr.bf16.mxu0 %v3305_v29 }
 0x483   : > { %3267 = vmatprep.subr.msk.bf16.mxu1 %vm4042_vm2, %v3265_v31 }
 0x485   : > { %3308 = vmatpush3.bf16.msra.mxu0 %v3305_v29 }
 0x486   : > { %3310 = vmatprep.subr.bf16.mxu0 %v3309_v45 }
 0x489   : > { %3312 = vmatpush3.bf16.msra.mxu0 %v3309_v45 }
 0x48a   : > { %3270 = vmatpush3.bf16.xpose.msk.msra.mxu1 %vm4042_vm2, %v3265_v31  ;;  %3314 = vmatprep.subr.bf16.mxu0 %v3313_v49 }
 0x48b   : > { %3273 = vmatprep.subr.msk.bf16.mxu1 %vm4042_vm2, %v3271_v15 }
 0x48d   : > { %3316 = vmatpush3.bf16.msra.mxu0 %v3313_v49 }
 0x492   : > { %3276 = vmatpush3.bf16.xpose.msk.msra.mxu1 %vm4042_vm2, %v3271_v15 }
 0x493   : > { %3279 = vmatprep.subr.msk.bf16.mxu1 %vm4042_vm2, %v3277_v16 }
 0x49a   : > { %3282 = vmatpush3.bf16.xpose.msk.msra.mxu1 %vm4042_vm2, %v3277_v16 }
 0x49b   : > { %3285 = vmatprep.subr.msk.bf16.mxu1 %vm4042_vm2, %v3283_v55 }
 0x4a2   : > { %3288 = vmatpush3.bf16.xpose.msk.msra.mxu1 %vm4042_vm2, %v3283_v55 }
 0x4a9   : > { %2939 = vmatmul.mubr.msk.f32.vlgmr.msra.gmra.mrb[26].mxu1 %vm851_vm1, %v4348_v52  ;;  %v1804_v52 = vld [vmem:[#allocation2 + $0x10] sm:$0xff] }
 0x4aa   : > { %v3641_v59 = vpack.i.bf16 %v1805_v51, %v1804_v52 }
 0x53b   : > { %v4384_v38 = vpop.f32.mrb[24].mxu1 }
 0x53c   : > { %v4386_v17 = vpop.f32.mrb[25].mxu1 }
 0x57c   : > { %v2940_v56 = vpop.f32.mrb[26].mxu1 }
 0x57d   : > { %v1631_v46 = vadd.f32 %v2940_v56, %v4206_v32  ;;  %v1625_v57 = vpop.f32.mrb[27].mxu1 }
 0x57e   : > { %v1626_v1 = vadd.f32 %v1625_v57, %v4206_v32 }
 0x57f   : > { %1636 = vmax.xlane.f32.xlu1 %v1631_v46 }
 0x580   : > { %1634 = vmax.xlane.f32.xlu0 %v1626_v1 }
 0x590   : > { %3637 = vrot.lane.b32.xlu1 %v3636_v5, %s3831_s8 }
 0x594   : > { %3647 = vrot.lane.b32.xlu1 %v4072_v4, %s3831_s8 }
 0x596   : > { %3632 = vrot.lane.b32.xlu0 %v4295_v36, %s3830_s22  ;;  %s309_s22 = sand.u32 1, %s3810_s25  }
 0x597   : > { %s4529_s30 = scalar_lea.sflag [#allocation6], %s309_s22 }
 0x598   : > { %3657 = vrot.lane.b32.xlu1 %v4103_v24, %s3831_s8 }
 0x59a   : > { %3642 = vrot.lane.b32.xlu0 %v3641_v59, %s3831_s8 }
 0x59c   : > { %3667 = vrot.lane.b32.xlu1 %v4121_v34, %s3831_s8 }
 0x59e   : > { %3652 = vrot.lane.b32.xlu0 %v4087_v13, %s3831_s8 }
 0x5a0   : > { %1834 = vrot.lane.b32.xlu1 %v4080_v10, %s3831_s8 }
 0x5a2   : > { %3662 = vrot.lane.b32.xlu0 %v4111_v26, %s3831_s8 }
 0x5a4   : > { %3677 = vrot.lane.b32.xlu1 %v4156_v58, %s3831_s8 }
 0x5a6   : > { %3672 = vrot.lane.b32.xlu0 %v4133_v43, %s3831_s8 }
 0x5a8   : > { %3682 = vrot.lane.b32.xlu1 %v4216_v39, %s3831_s8 }
 0x5aa   : > { %1836 = vrot.lane.b32.xlu0 %v4074_v6, %s3831_s8 }
 0x5ac   : > { %3692 = vrot.lane.b32.xlu1 %v4222_v41, %s3831_s8 }
 0x5ae   : > { %3687 = vrot.lane.b32.xlu0 %v4166_v63, %s3831_s8 }
 0x5b2   : > { %3697 = vrot.lane.b32.xlu0 %v4174_v3, %s3831_s8 }
 0x5b6   : > { %3702 = vrot.lane.b32.xlu0 %v4228_v42, %s3831_s8 }
 0x60c   : > { %v1637_v4 = vpop.xlane.xlu1 %1636 }
 0x60d   : > { %v1639_v10 = vsub.f32 %v1631_v46, %v1637_v4  ;;  %v1635_v13 = vpop.xlane.xlu0 %1634 }
 0x60e   : > { %v1638_v24 = vsub.f32 %v1626_v1, %v1635_v13 }
 0x60f   : > { %v1642_v26 = vmul.f32 1.442695, %v1639_v10 }
 0x610   : > { %v1640_v34 = vmul.f32 1.442695, %v1638_v24  ;;  %v3638_v43 = vpop.permute.xlu1 %3637 }
 0x611   : > { %v3640_v6 = vunpack.i.h.bf16 %v3638_v43  ;;  %v3633_v58 = vpop.permute.xlu0 %3632  ;;  %v3639_v39 = vunpack.i.l.bf16 %v3638_v43 }
 0x612   : > { %3724 = vpow2.f32 %v1640_v34  ;;  %v3635_v41 = vunpack.i.h.bf16 %v3633_v58  ;;  %v3634_v36 = vunpack.i.l.bf16 %v3633_v58 }
 0x613   : > { %3726 = vpow2.f32 %v1642_v26  ;;  %v3321_v0 = vpack.c.bf16 %v3640_v6, %v3639_v39 }
 0x614   : > { %v3317_v63 = vpack.c.bf16 %v3635_v41, %v3634_v36  ;;  %v3648_v62 = vpop.permute.xlu1 %3647 }
 0x615   : > { %v3643_v3 = vpop.permute.xlu0 %3642  ;;  %v3650_v30 = vunpack.i.h.bf16 %v3648_v62  ;;  %v3649_v11 = vunpack.i.l.bf16 %v3648_v62 }
 0x616   : > { %3318 = vmatprep.subr.bf16.mxu0 %v3317_v63  ;;  %v3645_v8 = vunpack.i.h.bf16 %v3643_v3  ;;  %v3644_v9 = vunpack.i.l.bf16 %v3643_v3 }
 0x617   : > { %3320 = vmatpush3.bf16.msra.mxu0 %v3317_v63  ;;  %v3333_v45 = vpack.c.bf16 %v3650_v30, %v3649_v11  ;;  %v1833_v30 = vld [vmem:[#allocation3 + $0x78] sm:$0xff] }
 0x618   : > { %v3658_v42 = vpop.permute.xlu1 %3657  ;;  %3323 = vmatprep.subr.msk.bf16.mxu0 %vm4042_vm2, %v3321_v0  ;;  %v3327_v28 = vpack.c.bf16 %v3645_v8, %v3644_v9  ;;  %v3711_v11 = vpack.i.bf16 %v1833_v30, %v1832_v48 }
 0x619   : > { %v3653_v7 = vpop.permute.xlu0 %3652  ;;  %v3660_v4 = vunpack.i.h.bf16 %v3658_v42  ;;  %v3659_v10 = vunpack.i.l.bf16 %v3658_v42 }
 0x61a   : > { %v3655_v18 = vunpack.i.h.bf16 %v3653_v7  ;;  %v3654_v54 = vunpack.i.l.bf16 %v3653_v7 }
 0x61b   : > { %v3345_v34 = vpack.c.bf16 %v3660_v4, %v3659_v10 }
 0x61c   : > { %v4424_v14 = vpop.eup %3724  ;;  %v4426_v23 = vpop.permute.xlu1 %3667  ;;  %v3339_v2 = vpack.c.bf16 %v3655_v18, %v3654_v54 }
 0x61d   : > { %v4428_v25 = vpop.eup %3726  ;;  %2973 = vmatprep.mubr.f32.mxu0 %v4424_v14  ;;  %v4431_v27 = vpop.permute.xlu0 %3662  ;;  %v3670_v41 = vunpack.i.h.bf16 %v4426_v23  ;;  %v3669_v36 = vunpack.i.l.bf16 %v4426_v23 }
 0x61e   : > { %2974 = vmatmul.mubr.f32.vlgmr.msra.gmra.mrb[16].mxu0 %v4428_v25  ;;  %v3665_v6 = vunpack.i.h.bf16 %v4431_v27  ;;  %v3664_v58 = vunpack.i.l.bf16 %v4431_v27 }
 0x61f   : > { %v3357_v63 = vpack.c.bf16 %v3670_v41, %v3669_v36 }
 0x620   : > { %v1835_v12 = vpop.permute.xlu1 %1834  ;;  %3326 = vmatpush3.bf16.xpose.msk.msra.mxu0 %vm4042_vm2, %v3321_v0  ;;  %v3351_v39 = vpack.c.bf16 %v3665_v6, %v3664_v58  ;;  %v2169_v6 = vld [vmem:[%s4581_s5 + $0x10] sm:$0xff]  ;;  %v2170_v58 = vld [vmem:[%s4581_s5 + $0x18] sm:$0xff] }
 0x621   : > { %v4436_v29 = vpop.permute.xlu0 %3672  ;;  %3329 = vmatprep.subr.msk.bf16.mxu0 %vm4042_vm2, %v3327_v28  ;;  %3008 = vmatprep.mubr.msk.f32.mxu0 %vm851_vm1, %v1835_v12  ;;  %v1831_v12 = vld [vmem:[#allocation3 + $0x68] sm:$0xff] }
 0x622   : > { %v3675_v62 = vunpack.i.h.bf16 %v4436_v29  ;;  %v3674_v3 = vunpack.i.l.bf16 %v4436_v29 }
 0x624   : > { %v3678_v31 = vpop.permute.xlu1 %3677  ;;  %v3363_v0 = vpack.c.bf16 %v3675_v62, %v3674_v3 }
 0x625   : > { %v3680_v33 = vunpack.i.h.bf16 %v3678_v31  ;;  %v3679_v35 = vunpack.i.l.bf16 %v3678_v31  ;;  %v4441_v22 = vpop.permute.xlu0 %1836 }
 0x627   : > { %v3369_v21 = vpack.c.bf16 %v3680_v33, %v3679_v35 }
 0x628   : > { %v3683_v47 = vpop.permute.xlu1 %3682  ;;  %3332 = vmatpush3.bf16.xpose.msk.msra.mxu0 %vm4042_vm2, %v3327_v28  ;;  %v1830_v28 = vld [vmem:[#allocation3 + $0x60] sm:$0xff] }
 0x629   : > { %v3685_v49 = vunpack.i.h.bf16 %v3683_v47  ;;  %v3684_v15 = vunpack.i.l.bf16 %v3683_v47  ;;  %3370 = vmatprep.subr.bf16.mxu1 %v3369_v21  ;;  %v3688_v50 = vpop.permute.xlu0 %3687  ;;  %3335 = vmatprep.subr.msk.bf16.mxu0 %vm4042_vm2, %v3333_v45  ;;  %v3706_v29 = vpack.i.bf16 %v1831_v12, %v1830_v28 }
 0x62a   : > { %v3690_v53 = vunpack.i.h.bf16 %v3688_v50  ;;  %v3689_v16 = vunpack.i.l.bf16 %v3688_v50  ;;  %3372 = vmatpush3.bf16.msra.mxu1 %v3369_v21 }
 0x62b   : > { %v3373_v55 = vpack.c.bf16 %v3685_v49, %v3684_v15 }
 0x62c   : > { %v3377_v56 = vpack.c.bf16 %v3690_v53, %v3689_v16  ;;  %v3693_v46 = vpop.permute.xlu1 %3692 }
 0x62d   : > { %v3695_v57 = vunpack.i.h.bf16 %v3693_v46  ;;  %v3694_v1 = vunpack.i.l.bf16 %v3693_v46  ;;  %3374 = vmatprep.subr.bf16.mxu1 %v3373_v55  ;;  %v3698_v20 = vpop.permute.xlu0 %3697 }
 0x62e   : > { %3376 = vmatpush3.bf16.msra.mxu1 %v3373_v55  ;;  %v3700_v52 = vunpack.i.h.bf16 %v3698_v20  ;;  %v3699_v51 = vunpack.i.l.bf16 %v3698_v20 }
 0x62f   : > { %3378 = vmatprep.subr.bf16.mxu1 %v3377_v56  ;;  %v3381_v5 = vpack.c.bf16 %v3695_v57, %v3694_v1 }
 0x630   : > { %3338 = vmatpush3.bf16.xpose.msk.msra.mxu0 %vm4042_vm2, %v3333_v45  ;;  %v3385_v13 = vpack.c.bf16 %v3700_v52, %v3699_v51 }
 0x631   : > { %3341 = vmatprep.subr.msk.bf16.mxu0 %vm4042_vm2, %v3339_v2  ;;  %v3703_v59 = vpop.permute.xlu0 %3702 }
 0x632   : > { %3380 = vmatpush3.bf16.msra.mxu1 %v3377_v56  ;;  %v3705_v24 = vunpack.i.h.bf16 %v3703_v59  ;;  %v3704_v26 = vunpack.i.l.bf16 %v3703_v59 }
 0x633   : > { %3382 = vmatprep.subr.bf16.mxu1 %v3381_v5 }
 0x634   : > { %v3389_v43 = vpack.c.bf16 %v3705_v24, %v3704_v26 }
 0x636   : > { %3384 = vmatpush3.bf16.msra.mxu1 %v3381_v5 }
 0x637   : > { %3386 = vmatprep.subr.bf16.mxu1 %v3385_v13 }
 0x638   : > { %3344 = vmatpush3.bf16.xpose.msk.msra.mxu0 %vm4042_vm2, %v3339_v2 }
 0x639   : > { %3347 = vmatprep.subr.msk.bf16.mxu0 %vm4042_vm2, %v3345_v34 }
 0x63a   : > { %3388 = vmatpush3.bf16.msra.mxu1 %v3385_v13 }
 0x63b   : > { %3390 = vmatprep.subr.bf16.mxu1 %v3389_v43 }
 0x63e   : > { %3392 = vmatpush3.bf16.msra.mxu1 %v3389_v43 }
 0x640   : > { %3350 = vmatpush3.bf16.xpose.msk.msra.mxu0 %vm4042_vm2, %v3345_v34 }
 0x641   : > { %3353 = vmatprep.subr.msk.bf16.mxu0 %vm4042_vm2, %v3351_v39 }
 0x648   : > { %3356 = vmatpush3.bf16.xpose.msk.msra.mxu0 %vm4042_vm2, %v3351_v39  ;;  %v3405_v39 = vpack.c.bf16 %v2170_v58, %v2169_v6 }
 0x649   : > { %3359 = vmatprep.subr.msk.bf16.mxu0 %vm4042_vm2, %v3357_v63 }
 0x650   : > { %3362 = vmatpush3.bf16.xpose.msk.msra.mxu0 %vm4042_vm2, %v3357_v63 }
 0x651   : > { %3365 = vmatprep.subr.msk.bf16.mxu0 %vm4042_vm2, %v3363_v0 }
 0x658   : > { %3368 = vmatpush3.bf16.xpose.msk.msra.mxu0 %vm4042_vm2, %v3363_v0 }
 0x65f   : > { %3009 = vmatmul.mubr.msk.f32.vlgmr.msra.gmra.mrb[18].mxu0 %vm851_vm1, %v4441_v22 }
 0x6f1   : > { %v4477_v42 = vpop.f32.mrb[16].mxu0 }
 0x6f2   : > { %v4479_v7 = vpop.f32.mrb[17].mxu0 }
 0x732   : > { %v3010_v8 = vpop.f32.mrb[18].mxu0 }
 0x733   : > { %v1994_v9 = vadd.f32 %v3010_v8, %v4206_v32  ;;  %v1988_v23 = vpop.f32.mrb[19].mxu0 }
 0x734   : > { %v1989_v27 = vadd.f32 %v1988_v23, %v4206_v32  ;;  %v2484_v23 = vld [vmem:[%s4582_s6] ss:$0 sm:$0xff] }
 0x735   : > { %1999 = vmax.xlane.f32.xlu1 %v1994_v9 }
 0x736   : > { %1997 = vmax.xlane.f32.xlu0 %v1989_v27 }
 0x746   : > { %3707 = vrot.lane.b32.xlu1 %v3706_v29, %s3831_s8 }
 0x74c   : > { %3712 = vrot.lane.b32.xlu0 %v3711_v11, %s3831_s8  ;;  %s2373_s8 = sshll.u32 %s309_s22, 4 }
 0x74d   : > { %s311_s16 = scalar_lea.vmem [#allocation5], %s2373_s8 }
 0x74e   : > { %s2277_s17 = sshll.u32 %s311_s16, 4  ;;  %s4520_s17 = int_to_ptr.vmem [resolvable:$true] %s2277_s17 }
 0x74f   : > { %s3748_s27 = scalar_lea.vmem %s4520_s17, 256 }
 0x750   : > { %p3749_p12 = scmp.ne.s32.totalorder %s4520_s17, %s3748_s27 }
 0x752   : > { %p3750_p13 = pnand %p3749_p12, %p3917_p4 }
 0x754   : > { %p3751_p0 = pneg %p3750_p13 }
 0x76a   : > { %1281 = vadd.xlane.f32.xlu1 %v4331_v37 }
 0x76b   : > { %1283 = vadd.xlane.f32.xlu0 %v4335_v44 }
 0x76e   : > { %1646 = vadd.xlane.f32.xlu1 %v4428_v25 }
 0x76f   : > { %1644 = vadd.xlane.f32.xlu0 %v4424_v14 }
 0x7c2   : > { %v2000_v32 = vpop.xlane.xlu1 %1999 }
 0x7c3   : > { %v2002_v31 = vsub.f32 %v1994_v9, %v2000_v32  ;;  %v1998_v33 = vpop.xlane.xlu0 %1997 }
 0x7c4   : > { %v2001_v35 = vsub.f32 %v1989_v27, %v1998_v33 }
 0x7c5   : > { %v2005_v22 = vmul.f32 1.442695, %v2002_v31 }
 0x7c6   : > { %v2003_v45 = vmul.f32 1.442695, %v2001_v35  ;;  %v3708_v21 = vpop.permute.xlu1 %3707 }
 0x7c7   : > { %3728 = vpow2.f32 %v2005_v22  ;;  %v3710_v47 = vunpack.i.h.bf16 %v3708_v21  ;;  %v3709_v49 = vunpack.i.l.bf16 %v3708_v21  ;;  %v3713_v15 = vpop.permute.xlu0 %3712 }
 0x7c8   : > { %3730 = vpow2.f32 %v2003_v45  ;;  %v3715_v50 = vunpack.i.h.bf16 %v3713_v15  ;;  %v3714_v37 = vunpack.i.l.bf16 %v3713_v15 }
 0x7c9   : > { %v3393_v53 = vpack.c.bf16 %v3710_v47, %v3709_v49 }
 0x7ca   : > { %v3397_v44 = vpack.c.bf16 %v3715_v50, %v3714_v37 }
 0x7cb   : > { %3394 = vmatprep.subr.bf16.mxu1 %v3393_v53 }
 0x7cc   : > { %3396 = vmatpush3.bf16.msra.mxu1 %v3393_v53 }
 0x7cd   : > { %3398 = vmatprep.subr.bf16.mxu1 %v3397_v44 }
 0x7d0   : > { %3400 = vmatpush3.bf16.msra.mxu1 %v3397_v44 }
 0x7d1   : > { %v3729_v14 = vpop.eup %3728 }
 0x7d2   : > { %v3731_v25 = vpop.eup %3730  ;;  %2009 = vadd.xlane.f32.xlu1 %v3729_v14 }
 0x7d3   : > { %2007 = vadd.xlane.f32.xlu0 %v3731_v25  ;;  %3043 = vmatprep.mubr.f32.mxu1 %v3731_v25 }
 0x7d4   : > { %3044 = vmatmul.mubr.f32.vlgmr.msra.gmra.mrb[28].mxu1 %v3729_v14 }
 0x7d6   : > { %993 = vadd.xlane.f32.xlu1 %v4237_v61 }
 0x7d7   : > { %991 = vadd.xlane.f32.xlu0 %v4234_v40 }
 0x7f7   : > { %v1282_v16 = vpop.xlane.xlu1 %1281 }
 0x7f8   : > { %3732 = vrcp.f32 %v1282_v16  ;;  %v1284_v18 = vpop.xlane.xlu0 %1283 }
 0x7f9   : > { %3734 = vrcp.f32 %v1284_v18 }
 0x7fb   : > { %v1647_v54 = vpop.xlane.xlu1 %1646 }
 0x7fc   : > { %3736 = vrcp.f32 %v1647_v54  ;;  %v1645_v55 = vpop.xlane.xlu0 %1644 }
 0x7fd   : > { %3738 = vrcp.f32 %v1645_v55 }
 0x802   : > { %v3733_v56 = vpop.eup %3732 }
 0x803   : > { %v3735_v46 = vpop.eup %3734  ;;  %v1426_v57 = vmul.f32 %v3733_v56, %v4386_v17 }
 0x804   : > { %v1427_v1 = vmul.f32 %v3735_v46, %v4384_v38 }
 0x805   : > { %1430 = vrot.lane.b32.xlu0 %v1426_v57, %s3832_s10 }
 0x806   : > { %v3737_v61 = vpop.eup %3736  ;;  %1432 = vrot.lane.b32.xlu1 %v1427_v1, %s3832_s10 }
 0x807   : > { %v3739_v40 = vpop.eup %3738  ;;  %v1790_v20 = vmul.f32 %v3737_v61, %v4477_v42 }
 0x808   : > { %v1789_v2 = vmul.f32 %v3739_v40, %v4479_v7 }
 0x809   : > { %1795 = vrot.lane.b32.xlu0 %v1790_v20, %s3833_s12 }
 0x80a   : > { %1793 = vrot.lane.b32.xlu1 %v1789_v2, %s3833_s12 }
 0x85f   : > { %v2010_v5 = vpop.xlane.xlu1 %2009 }
 0x860   : > { %v2008_v52 = vpop.xlane.xlu0 %2007 }
 0x863   : > { %v994_v51 = vpop.xlane.xlu1 %993 }
 0x864   : > { %3740 = vrcp.f32 %v994_v51  ;;  %v992_v17 = vpop.xlane.xlu0 %991 }
 0x865   : > { %3742 = vrcp.f32 %v992_v17 }
 0x866   : > { %3744 = vrcp.f32 %v2010_v5 }
 0x867   : > { %3746 = vrcp.f32 %v2008_v52 }
 0x86e   : > { %v3741_v38 = vpop.eup %3740 }
 0x86f   : > { %v3743_v59 = vpop.eup %3742  ;;  %v1073_v4 = vmul.f32 %v3741_v38, %v4283_v19  ;;  %v2167_v19 = vld [vmem:[%s4581_s5] sm:$0xff] }
 0x870   : > { %v1072_v10 = vmul.f32 %v3743_v59, %v4285_v60  ;;  %v2168_v60 = vld [vmem:[%s4581_s5 + $0x8] sm:$0xff]  ;;  %v3745_v41 = vpop.eup %3744 }
 0x871   : > { %1075 = vst.msk [vmem:[#allocation4 + $0x8] sm:$0xff] %vm851_vm1, %v1073_v4  ;;  %v3401_v43 = vpack.c.bf16 %v2168_v60, %v2167_v19  ;;  %v3747_v63 = vpop.eup %3746 }
 0x872   : > { %1074 = vst.msk [vmem:[#allocation4] sm:$0xff] %vm851_vm1, %v1072_v10 }
 0x873   : > { %3402 = vmatprep.subr.bf16.mxu1 %v3401_v43 }
 0x874   : > { %3404 = vmatpush3.bf16.msra.mxu1 %v3401_v43 }
 0x875   : > { %3406 = vmatprep.subr.bf16.mxu1 %v3405_v39 }
 0x877   : > { %v1431_v13 = vpop.permute.xlu0 %1430 }
 0x878   : > { %1437 = vst.msk [vmem:[#allocation4] sm:$0xff] %vm1436_vm4, %v1431_v13  ;;  %v1433_v24 = vpop.permute.xlu1 %1432  ;;  %3408 = vmatpush3.bf16.msra.mxu1 %v3405_v39 }
 0x879   : > { %1438 = vst.msk [vmem:[#allocation4 + $0x8] sm:$0xff] %vm1436_vm4, %v1433_v24 }
 0x87b   : > { %v1796_v26 = vpop.permute.xlu0 %1795 }
 0x87c   : > { %1801 = vst.msk [vmem:[#allocation4 + $0x8] sm:$0xff] %vm1799_vm5, %v1796_v26  ;;  %v1794_v34 = vpop.permute.xlu1 %1793 }
 0x87d   : > { %1800 = vst.msk [vmem:[#allocation4] sm:$0xff] %vm1799_vm5, %v1794_v34 }
 0x8a7   : > { %v3045_v36 = vpop.f32.mrb[28].mxu1 }
 0x8a8   : > { %v2153_v62 = vmul.f32 %v3745_v41, %v3045_v36  ;;  %v2141_v3 = vpop.f32.mrb[29].mxu1 }
 0x8a9   : > { %v2152_v0 = vmul.f32 %v3747_v63, %v2141_v3 }
 0x8aa   : > { %2158 = vrot.lane.b32.xlu0 %v2153_v62, %s3834_s23 }
 0x8ab   : > { %2156 = vrot.lane.b32.xlu1 %v2152_v0, %s3834_s23  ;;  %s3835_s23 = smov [#allocation5]  }
 0x8ac   : > { %s3752_s8 = sshll.u32 %s3835_s23, 4  ;;  %s3753_s8 = int_to_ptr.vmem [resolvable:$false] %s3752_s8 }
 0x8ad   : > { %s3754_s12 = scalar_lea.vmem %s3753_s8, 512  ;;  %p3755_p1 = scmp.lt.s32.totalorder %s4520_s17, %s3753_s8 }
 0x8ae   : > { %p3756_p2 = scmp.lt.s32.totalorder %s3754_s12, %s3748_s27 }
 0x8b0   : > { %p3757_p3 = por %p3756_p2, %p3755_p1 }
 0x8b2   : > { %p3758_p5 = pnand %p3757_p3, %p3751_p0 }
 0x91c   : > { %v2159_v42 = vpop.permute.xlu0 %2158 }
 0x91d   : > { %2164 = vst.msk [vmem:[#allocation4 + $0x8] sm:$0xff] %vm2162_vm6, %v2159_v42  ;;  %v2157_v7 = vpop.permute.xlu1 %2156 }
 0x91e   : > { %2163 = vst.msk [vmem:[#allocation4] sm:$0xff] %vm2162_vm6, %v2157_v7 }
 0x924   : > { %v2166_v9 = vld [vmem:[#allocation4 + $0x8] sm:$0xff] }
 0x925   : > { %v2165_v8 = vld [vmem:[#allocation4] sm:$0xff] }
 0x926   : > { %3054 = vmatprep.mubr.msk.f32.mxu1 %vm352_vm0, %v2165_v8 }
 0x927   : > { %3055 = vmatmul.mubr.msk.f32.vlgmr.msra.gmra.mrb[30].mxu1 %vm352_vm0, %v2166_v9 }
 0x9fa   : > { %v3056_v27 = vpop.f32.mrb[30].mxu1 }
 0x9fb   : > { %v2256_v28 = vadd.f32 %v3056_v27, %v2484_v23  ;;  %v2250_v12 = vpop.f32.mrb[31].mxu1 }
 0x9fc   : > { %v2251_v29 = vadd.f32 %v2484_v23, %v2250_v12 }
 0x9fd   : > { %2260 = vst.msk [vmem:[%s311_s16 + $0x8] sm:$0xff] %vm352_vm0, %v2256_v28 }
 0x9fe   : > { %2259 = vst.msk [vmem:[%s311_s16] sm:$0xff] %vm352_vm0, %v2251_v29 }
 0x9ff   : > { %3761 = shalt.err (!%p3758_p5)
}
 0xa00   : > { %s3762_s22 = scalar_lea.hbm %s4525_s21, 256  ;;  %s3766_s18 = scalar_lea.hbm %s4583_s7, 512 }
 0xa01   : > { %p3763_p6 = scmp.ne.s32.totalorder %s4525_s21, %s3762_s22  ;;  %p3767_p10 = scmp.lt.u32.totalorder %s4525_s21, %s4583_s7 }
 0xa02   : > { %p3768_p11 = scmp.lt.u32.totalorder %s3766_s18, %s3762_s22  ;;  %p3770_p13 = scmp.lt.u32.totalorder %s3762_s22, %s4525_s21 }
 0xa03   : > { %p3764_p7 = pnand %p3763_p6, %p3917_p4 }
 0xa04   : > { %p3769_p12 = por %p3768_p11, %p3767_p10 }
 0xa05   : > { %p3765_p9 = pneg %p3764_p7 }
 0xa06   : > { %p3771_p0 = por %p3770_p13, %p3769_p12 }
 0xa08   : > { %p3772_p1 = pnand %p3771_p0, %p3765_p9 }
 0xa0a   : > { %3775 = shalt.err (!%p3772_p1)
}
 0xa0b   : > { %s3836_s27 = smov 128  }
 0xa0c   : > { %3413 = dma.vmem_to_hbm [thread:$0]  (%p3917_p4), %s4520_s17, 256, %s4525_s21, %s4529_s30, %s3836_s27, %s3836_s27, %s3832_s10  }
 0xa0d PF: > { %p3419_p2 = scmp.ge.s32.totalorder %s3826_s29, 2  ;;  %s2292_s23 = sand.u32 1, %s3806_s24  }
 0xa0e   : > { %s2293_s8 = scalar_lea.sflag [#allocation6], %s2292_s23 }
 0xa0f   : > { %p3416_p3 = pnand %p3419_p2, %p3924_p8 }
 0xa11   : > { %3801 = dma.done.wait (!%p3416_p3), %s2293_s8, 256  }
 0xa12   : > { %3803 = vsyncadd (!%p3416_p3), %s2293_s8, 4294967040  ;;  %s20_s29 = sadd.s32 1, %s3826_s29   ;;  %s4588_s24 = smov %s3810_s25 }
 0xa13   : > { %p17_p5 = scmp.ge.s32.totalorder %s20_s29, 4   ;;  %s4589_s25 = smov %s3814_s26 }
 0xa14   : > { %s4590_s26 = smov %s3930_s14  ;;  %s4591_s27 = smov %s3822_s28 }
 0xa15   : > { %s4592_s28 = smov %s4594_s9  ;;  %19 = sbr.rel (!%p17_p5) target bundleno = 4 (0x4), region = 90 }
 0xa1c   :  { %2298 = vsyncpa [#allocation6], 1 }
 0xa1d   :  { %2300 = vsyncpa [#allocation6 + $0x1], 1 }

</bundles_post_ra>
